<compile_context>
chip_gen: v5e
topology: v5e:2x2
jax: 0.10.0
libtpu: 0.0.40
codegen_flags: <defaults>
</compile_context>

<pallas_src>
import functools
import math

import jax
import jax.numpy as jnp
from jax.experimental import pallas as pl
from jax.experimental.pallas import tpu as pltpu

MATMUL_DTYPE = jnp.bfloat16   # MXU operand dtype; accumulation is always f32.


# ---------------------------------------------------------------------------
# In-kernel helpers (f32 elementwise math)
# ---------------------------------------------------------------------------
def _erf_approx(z):
    # Abramowitz & Stegun 7.1.26, max abs error ~1.5e-7.
    a1, a2, a3, a4, a5 = 0.254829592, -0.284496736, 1.421413741, -1.453152027, 1.061405429
    p = 0.3275911
    sgn = jnp.where(z >= 0.0, 1.0, -1.0)
    za = jnp.abs(z)
    t = pl.reciprocal(1.0 + p * za, approx=True)          # divide -> EUP slot
    poly = ((((a5 * t + a4) * t + a3) * t + a2) * t + a1) * t
    return sgn * (1.0 - poly * jnp.exp(-za * za))


def _gelu_exact(v):
    # nn.GELU() default: 0.5 * x * (1 + erf(x / sqrt(2)))
    return 0.5 * v * (1.0 + _erf_approx(v * (1.0 / math.sqrt(2.0))))


def _layernorm(v, eps=1e-5):
    mu = jnp.mean(v, axis=-1, keepdims=True)
    var = jnp.mean((v - mu) ** 2, axis=-1, keepdims=True)
    return (v - mu) * jax.lax.rsqrt(var + eps)


# ---------------------------------------------------------------------------
# Fused encoder-stack kernel.  grid = (batch_blocks,); the layer loop is in-kernel.
#
# Operands (8 total per grid step):
#   ss_ref   : (L, b_blk, 1, 2C) f32   packed [scale | shift] from AdaLayerNorm's timestep path
#   x_ref    : (b_blk, T, C)     f32   activations for this batch block
#   wqkv_ref : (L, C, 3C)        bf16  fused Wq|Wk|Wv
#   wp_ref   : (L, C, C)         bf16  attention output projection
#   w1_ref   : (L, C, hid)       bf16  MLP in
#   w2_ref   : (L, hid, C)       bf16  MLP out
#   vec_ref  : (L, 1, 7C+hid)    f32   packed [bqkv | bp | ln2_g | ln2_b | b1 | b2]
#   o_ref    : (b_blk, T, C)           output (written once at the end)
# ---------------------------------------------------------------------------
def _encoder_stack_kernel(ss_ref, x_ref, wqkv_ref, wp_ref, w1_ref, w2_ref, vec_ref, o_ref,
                          *, n_layer, n_head, b_blk, seq_len, n_embd, mlp_hidden):
    T, C, H, hid = seq_len, n_embd, n_head, mlp_hidden
    D = C // H
    R = b_blk * T
    mdt = wqkv_ref.dtype                                   # bf16 MXU operand dtype
    sm_scale = 1.0 / math.sqrt(D)

    # Load the activation once; it stays resident for the whole layer stack.
    x = x_ref[...].astype(jnp.float32).reshape(R, C)       # (R, C) f32

    for l in range(n_layer):                               # static unroll (small L)
        # ---- AdaLayerNorm: LN(x, no affine) * (1 + scale) + shift (per batch element) ---------
        scale = ss_ref[l, :, :, 0:C]                       # (b_blk, 1, C)
        shift = ss_ref[l, :, :, C:2 * C]
        xn = _layernorm(x).reshape(b_blk, T, C)
        xn = xn * (1.0 + scale) + shift
        xn = xn.reshape(R, C).astype(mdt)                  # cast ONCE for the QKV matmul

        # ---- FullAttention: fused QKV matmul, per-head softmax attention ----------------------
        bqkv = vec_ref[l, :, 0:3 * C]                      # (1, 3C) f32
        qkv = jnp.dot(xn, wqkv_ref[l], preferred_element_type=jnp.float32) + bqkv
        qkv = qkv.reshape(b_blk, T, 3 * C).astype(mdt)     # cast ONCE for the attention matmuls

        y = jnp.zeros((R, C), jnp.float32)
        for h in range(H):                                 # small static head loop (proven lowering)
            q_h = qkv[:, :, h * D:(h + 1) * D]             # (b_blk, T, D) bf16
            k_h = qkv[:, :, C + h * D:C + (h + 1) * D]
            v_h = qkv[:, :, 2 * C + h * D:2 * C + (h + 1) * D]
            s = jnp.einsum('btd,bsd->bts', q_h, k_h,
                           preferred_element_type=jnp.float32) * sm_scale
            s = s - jnp.max(s, axis=-1, keepdims=True)
            p = jnp.exp(s)
            p = p * pl.reciprocal(jnp.sum(p, axis=-1, keepdims=True), approx=True)
            yh = jnp.einsum('bts,bsd->btd', p.astype(mdt), v_h,
                            preferred_element_type=jnp.float32)         # (b_blk, T, D) f32
            # Fold head h straight into the output projection (no lane-axis concat):
            #   y @ Wp == sum_h y_h @ Wp[h*D:(h+1)*D, :]
            y = y + jnp.dot(yh.reshape(R, D).astype(mdt), wp_ref[l, h * D:(h + 1) * D, :],
                            preferred_element_type=jnp.float32)
        x = x + y + vec_ref[l, :, 3 * C:4 * C]             # residual 1 (+ proj bias)

        # ---- LayerNorm + GELU MLP --------------------------------------------------------------
        g2 = vec_ref[l, :, 4 * C:5 * C]
        b2ln = vec_ref[l, :, 5 * C:6 * C]
        xn2 = (_layernorm(x) * g2 + b2ln).astype(mdt)      # cast ONCE
        h1 = jnp.dot(xn2, w1_ref[l], preferred_element_type=jnp.float32) \
            + vec_ref[l, :, 6 * C:6 * C + hid]
        h1 = _gelu_exact(h1).astype(mdt)                   # cast ONCE
        m = jnp.dot(h1, w2_ref[l], preferred_element_type=jnp.float32) \
            + vec_ref[l, :, 6 * C + hid:7 * C + hid]
        x = x + m                                          # residual 2

    # Single HBM write per batch block.
    o_ref[...] = x.reshape(b_blk, T, C).astype(o_ref.dtype)


def _pick_b_blk(batch):
    """Per-generation batch blocking.

    v7x has 2 TensorCores per chip -> give the 'parallel' batch axis >= 2 blocks so it can
    shard across them.  v5e / v6e have a single TensorCore -> keep the whole batch in one
    tall block (fewer grid steps, taller MXU LHS)."""
    try:
        kind = jax.devices()[0].device_kind.lower()
    except Exception:
        kind = ""
    if "v7" in kind and batch % 2 == 0 and batch >= 2:
        return batch // 2
    return batch


def encoder_stack(x, ss, wqkv, wp, w1, w2, vec, *, n_head, n_layer, mlp_hidden, b_blk=None):
    """x: (B,T,C) f32; ss: (L,B,1,2C) f32; weights bf16 (layer-stacked); vec: (L,1,7C+hid) f32."""
    B, T, C = x.shape
    L, hid = n_layer, mlp_hidden
    if b_blk is None:
        b_blk = _pick_b_blk(B)
    assert B % b_blk == 0
    nb = B // b_blk

    kernel = functools.partial(_encoder_stack_kernel, n_layer=L, n_head=n_head,
                               b_blk=b_blk, seq_len=T, n_embd=C, mlp_hidden=hid)

    def resident(shape):          # full-array block, constant block index -> VMEM-resident weights
        return pl.BlockSpec(shape, lambda b: (0,) * len(shape))

    grid_spec = pltpu.PrefetchScalarGridSpec(
        num_scalar_prefetch=0,
        grid=(nb,),
        in_specs=[
            pl.BlockSpec((L, b_blk, 1, 2 * C), lambda b: (0, b, 0, 0)),   # packed scale|shift
            pl.BlockSpec((b_blk, T, C), lambda b: (b, 0, 0)),             # x
            resident((L, C, 3 * C)),                                      # fused Wqkv
            resident((L, C, C)),                                          # Wproj
            resident((L, C, hid)),                                        # MLP W1
            resident((L, hid, C)),                                        # MLP W2
            resident((L, 1, 7 * C + hid)),                                # packed small operands
        ],
        out_specs=pl.BlockSpec((b_blk, T, C), lambda b: (b, 0, 0)),
    )
    return pl.pallas_call(
        kernel,
        out_shape=jax.ShapeDtypeStruct((B, T, C), x.dtype),
        grid_spec=grid_spec,
        compiler_params=pltpu.CompilerParams(
            dimension_semantics=("parallel",),              # batch blocks shard across v7x's 2 TCs
        ),
    )(ss, x, wqkv, wp, w1, w2, vec)


# ---------------------------------------------------------------------------
# Glue: timestep embedding (tiny, plain JAX), weight stacking / packing
# ---------------------------------------------------------------------------
def sinusoidal_emb(t, dim):
    half = dim // 2
    freqs = jnp.exp(jnp.arange(half, dtype=jnp.float32) * -(math.log(10000.0) / (half - 1)))
    args = t.astype(jnp.float32)[:, None] * freqs[None, :]
    return jnp.concatenate([jnp.sin(args), jnp.cos(args)], axis=-1)   # (B, dim)


def encoder_forward(x, t, params, *, n_head, matmul_dtype=MATMUL_DTYPE, b_blk=None):
    B, T, C = x.shape
    L = len(params)
    hid = params[0]["w1"].shape[-1]

    # AdaLayerNorm timestep path (shared sinusoid/SiLU, per-layer Linear(C, 2C)).
    emb = sinusoidal_emb(t, C)
    emb = emb * jax.nn.sigmoid(emb)                                    # SiLU
    adaln_w = jnp.stack([p["adaln_w"] for p in params])                # (L, C, 2C)
    adaln_b = jnp.stack([p["adaln_b"] for p in params])                # (L, 2C)
    ss = jnp.einsum('bc,lcd->lbd', emb, adaln_w) + adaln_b[:, None, :]  # (L, B, 2C) = [scale|shift]
    ss = ss.reshape(L, B, 1, 2 * C)

    def stk(name):
        return jnp.stack([p[name] for p in params])

    wqkv = jnp.concatenate([stk("wq"), stk("wk"), stk("wv")], axis=-1).astype(matmul_dtype)
    wp = stk("wp").astype(matmul_dtype)
    w1 = stk("w1").astype(matmul_dtype)
    w2 = stk("w2").astype(matmul_dtype)
    # Packed small per-layer operands: [bqkv(3C) | bp(C) | ln2_g(C) | ln2_b(C) | b1(hid) | b2(C)]
    vec = jnp.concatenate([
        jnp.concatenate([stk("bq"), stk("bk"), stk("bv")], axis=-1),
        stk("bp"), stk("ln2_g"), stk("ln2_b"), stk("b1"), stk("b2"),
    ], axis=-1)                                                        # (L, 1, 7C+hid) f32

    return encoder_stack(x, ss, wqkv, wp, w1, w2, vec,
                         n_head=n_head, n_layer=L, mlp_hidden=hid, b_blk=b_blk)


# ---------------------------------------------------------------------------
# Pure-JAX reference (f32) for a sanity check
# ---------------------------------------------------------------------------
def encoder_reference(x, t, params, *, n_head):
    B, T, C = x.shape
    D = C // n_head

    def ln(v, eps=1e-5):
        mu = v.mean(-1, keepdims=True)
        var = ((v - mu) ** 2).mean(-1, keepdims=True)
        return (v - mu) / jnp.sqrt(var + eps)

    for p in params:
        emb = sinusoidal_emb(t, C)
        emb = emb * jax.nn.sigmoid(emb)
        emb = emb @ p["adaln_w"] + p["adaln_b"]
        scale, shift = emb[:, None, :C], emb[:, None, C:]
        xn = ln(x) * (1.0 + scale) + shift
        q = (xn @ p["wq"] + p["bq"]).reshape(B, T, n_head, D).transpose(0, 2, 1, 3)
        k = (xn @ p["wk"] + p["bk"]).reshape(B, T, n_head, D).transpose(0, 2, 1, 3)
        v = (xn @ p["wv"] + p["bv"]).reshape(B, T, n_head, D).transpose(0, 2, 1, 3)
        att = jax.nn.softmax((q @ jnp.swapaxes(k, -1, -2)) / math.sqrt(D), axis=-1)
        y = (att @ v).transpose(0, 2, 1, 3).reshape(B, T, C)
        x = x + (y @ p["wp"] + p["bp"])
        xn2 = ln(x) * p["ln2_g"] + p["ln2_b"]
        h1 = jax.nn.gelu(xn2 @ p["w1"] + p["b1"], approximate=False)
        x = x + (h1 @ p["w2"] + p["b2"])
    return x


def init_params(key, n_layer, n_embd, mlp_hidden_times):
    C = n_embd
    hid = mlp_hidden_times * C
    params = []
    for _ in range(n_layer):
        key, *ks = jax.random.split(key, 9)

        def nrm(k, shape):
            return (0.02 * jax.random.normal(k, shape)).astype(jnp.float32)

        params.append(dict(
            adaln_w=nrm(ks[0], (C, 2 * C)), adaln_b=jnp.zeros((2 * C,), jnp.float32),
            wq=nrm(ks[1], (C, C)), bq=nrm(ks[2], (1, C)),
            wk=nrm(ks[3], (C, C)), bk=jnp.zeros((1, C), jnp.float32),
            wv=nrm(ks[4], (C, C)), bv=jnp.zeros((1, C), jnp.float32),
            wp=nrm(ks[5], (C, C)), bp=jnp.zeros((1, C), jnp.float32),
            ln2_g=jnp.ones((1, C), jnp.float32), ln2_b=jnp.zeros((1, C), jnp.float32),
            w1=nrm(ks[6], (C, hid)), b1=jnp.zeros((1, hid), jnp.float32),
            w2=nrm(ks[7], (hid, C)), b2=jnp.zeros((1, C), jnp.float32),
        ))
    return params


if __name__ == "__main__":
    # Small config consistent with the module: n_layer=2, n_embd=32, n_head=4, mlp_hidden_times=4
    B, T, C, H, L, MLP = 2, 8, 32, 4, 2, 4

    key = jax.random.PRNGKey(0)
    kx, kt, kp = jax.random.split(key, 3)
    x = jax.random.normal(kx, (B, T, C), jnp.float32)
    t = jax.random.randint(kt, (B,), 0, 1000)              # diffusion timesteps
    params = init_params(kp, L, C, MLP)

    fwd = jax.jit(functools.partial(encoder_forward, n_head=H))
    out = fwd(x, t, params)
    jax.block_until_ready(out)
    assert out.shape == (B, T, C)

    # Sanity check vs. the f32 JAX reference (bf16 MXU operands + approx reciprocals -> loose tol).
    ref = encoder_reference(x, t, params, n_head=H)
    max_err = float(jnp.max(jnp.abs(out - ref)))
    assert max_err < 5e-2, f"max abs err {max_err}"

    print("KERNEL_OK")
</pallas_src>

<mosaic_0001>
module attributes {stable_mosaic.version = 11 : i64} {
  func.func @_encoder_stack_kernel(%arg0: i32, %arg1: memref<2x2x1x64xf32, #tpu.memory_space<vmem>>, %arg2: memref<2x8x32xf32, #tpu.memory_space<vmem>>, %arg3: memref<2x32x96xbf16, #tpu.memory_space<vmem>>, %arg4: memref<2x32x32xbf16, #tpu.memory_space<vmem>>, %arg5: memref<2x32x128xbf16, #tpu.memory_space<vmem>>, %arg6: memref<2x128x32xbf16, #tpu.memory_space<vmem>>, %arg7: memref<2x1x352xf32, #tpu.memory_space<vmem>>, %arg8: memref<2x8x32xf32, #tpu.memory_space<vmem>>) attributes {dimension_semantics = [#tpu.dimension_semantics<parallel>], iteration_bounds = array<i64: 1>, scalar_prefetch = 0 : i64, scratch_operands = 0 : i64, tpu.core_type = #tpu.core_type<tc>, window_params = [{transform_indices = @transform_0, window_bounds = array<i64: 2, 2, 1, 64>}, {transform_indices = @transform_1, window_bounds = array<i64: 2, 8, 32>}, {pipeline_mode = #tpu.pipeline_mode<synchronous>, transform_indices = @transform_2, window_bounds = array<i64: 2, 32, 96>}, {pipeline_mode = #tpu.pipeline_mode<synchronous>, transform_indices = @transform_3, window_bounds = array<i64: 2, 32, 32>}, {pipeline_mode = #tpu.pipeline_mode<synchronous>, transform_indices = @transform_4, window_bounds = array<i64: 2, 32, 128>}, {pipeline_mode = #tpu.pipeline_mode<synchronous>, transform_indices = @transform_5, window_bounds = array<i64: 2, 128, 32>}, {pipeline_mode = #tpu.pipeline_mode<synchronous>, transform_indices = @transform_6, window_bounds = array<i64: 2, 1, 352>}, {transform_indices = @transform_7, window_bounds = array<i64: 2, 8, 32>}]} {
    %c0 = arith.constant 0 : index
    %c0_0 = arith.constant 0 : index
    %c0_1 = arith.constant 0 : index
    %0 = vector.load %arg2[%c0, %c0_0, %c0_1] : memref<2x8x32xf32, #tpu.memory_space<vmem>>, vector<2x8x32xf32>
    %1 = vector.shape_cast %0 : vector<2x8x32xf32> to vector<16x32xf32>
    %c0_2 = arith.constant 0 : index
    %c0_3 = arith.constant 0 : index
    %c0_4 = arith.constant 0 : index
    %c0_5 = arith.constant 0 : index
    %2 = vector.load %arg1[%c0_2, %c0_3, %c0_4, %c0_5] : memref<2x2x1x64xf32, #tpu.memory_space<vmem>>, vector<1x2x1x32xf32>
    %3 = vector.shape_cast %2 : vector<1x2x1x32xf32> to vector<2x1x32xf32>
    %c0_6 = arith.constant 0 : index
    %c0_7 = arith.constant 0 : index
    %c0_8 = arith.constant 0 : index
    %c32 = arith.constant 32 : index
    %4 = vector.load %arg1[%c0_6, %c0_7, %c0_8, %c32] : memref<2x2x1x64xf32, #tpu.memory_space<vmem>>, vector<1x2x1x32xf32>
    %5 = vector.shape_cast %4 : vector<1x2x1x32xf32> to vector<2x1x32xf32>
    %cst = arith.constant dense<0.000000e+00> : vector<16xf32>
    %6 = vector.multi_reduction <add>, %1, %cst [1] : vector<16x32xf32> to vector<16xf32>
    %7 = vector.shape_cast %6 : vector<16xf32> to vector<16x1xf32>
    %cst_9 = arith.constant 3.200000e+01 : f32
    %8 = vector.broadcast %cst_9 : f32 to vector<16x1xf32>
    %9 = arith.divf %7, %8 : vector<16x1xf32>
    %10 = vector.broadcast %9 : vector<16x1xf32> to vector<16x32xf32>
    %11 = arith.subf %1, %10 : vector<16x32xf32>
    %12 = arith.mulf %11, %11 : vector<16x32xf32>
    %cst_10 = arith.constant dense<0.000000e+00> : vector<16xf32>
    %13 = vector.multi_reduction <add>, %12, %cst_10 [1] : vector<16x32xf32> to vector<16xf32>
    %14 = vector.shape_cast %13 : vector<16xf32> to vector<16x1xf32>
    %cst_11 = arith.constant 3.200000e+01 : f32
    %15 = vector.broadcast %cst_11 : f32 to vector<16x1xf32>
    %16 = arith.divf %14, %15 : vector<16x1xf32>
    %17 = vector.broadcast %9 : vector<16x1xf32> to vector<16x32xf32>
    %18 = arith.subf %1, %17 : vector<16x32xf32>
    %cst_12 = arith.constant 9.99999974E-6 : f32
    %19 = vector.broadcast %cst_12 : f32 to vector<16x1xf32>
    %20 = arith.addf %16, %19 : vector<16x1xf32>
    %21 = math.rsqrt %20 : vector<16x1xf32>
    %22 = vector.broadcast %21 : vector<16x1xf32> to vector<16x32xf32>
    %23 = arith.mulf %18, %22 : vector<16x32xf32>
    %24 = vector.shape_cast %23 : vector<16x32xf32> to vector<2x8x32xf32>
    %cst_13 = arith.constant 1.000000e+00 : f32
    %25 = vector.broadcast %cst_13 : f32 to vector<2x1x32xf32>
    %26 = arith.addf %25, %3 : vector<2x1x32xf32>
    %27 = vector.broadcast %26 : vector<2x1x32xf32> to vector<2x8x32xf32>
    %28 = arith.mulf %24, %27 : vector<2x8x32xf32>
    %29 = vector.broadcast %5 : vector<2x1x32xf32> to vector<2x8x32xf32>
    %30 = arith.addf %28, %29 : vector<2x8x32xf32>
    %31 = vector.shape_cast %30 : vector<2x8x32xf32> to vector<16x32xf32>
    %32 = arith.truncf %31 : vector<16x32xf32> to vector<16x32xbf16>
    %c0_14 = arith.constant 0 : index
    %c0_15 = arith.constant 0 : index
    %c0_16 = arith.constant 0 : index
    %33 = vector.load %arg7[%c0_14, %c0_15, %c0_16] : memref<2x1x352xf32, #tpu.memory_space<vmem>>, vector<1x1x96xf32>
    %34 = vector.shape_cast %33 : vector<1x1x96xf32> to vector<1x96xf32>
    %c0_17 = arith.constant 0 : index
    %c0_18 = arith.constant 0 : index
    %c0_19 = arith.constant 0 : index
    %35 = vector.load %arg3[%c0_17, %c0_18, %c0_19] : memref<2x32x96xbf16, #tpu.memory_space<vmem>>, vector<1x32x96xbf16>
    %36 = vector.shape_cast %35 : vector<1x32x96xbf16> to vector<32x96xbf16>
    %cst_20 = arith.constant dense<0.000000e+00> : vector<16x96xf32>
    %37 = tpu.matmul %32, %36, %cst_20 {dimension_numbers = #tpu.dot_dimension_numbers<[1], [0], [0], [1], [0, 0, 1, 1], [], []>} : vector<16x32xbf16>, vector<32x96xbf16>, vector<16x96xf32> -> vector<16x96xf32>
    %38 = vector.broadcast %34 : vector<1x96xf32> to vector<16x96xf32>
    %39 = arith.addf %37, %38 : vector<16x96xf32>
    %40 = vector.shape_cast %39 : vector<16x96xf32> to vector<2x8x96xf32>
    %41 = arith.truncf %40 : vector<2x8x96xf32> to vector<2x8x96xbf16>
    %cst_21 = arith.constant 0.000000e+00 : f32
    %42 = vector.broadcast %cst_21 : f32 to vector<16x32xf32>
    %43 = vector.extract_strided_slice %41 {offsets = [0, 0, 0], sizes = [2, 8, 8], strides = [1, 1, 1]} : vector<2x8x96xbf16> to vector<2x8x8xbf16>
    %44 = vector.extract_strided_slice %41 {offsets = [0, 0, 32], sizes = [2, 8, 8], strides = [1, 1, 1]} : vector<2x8x96xbf16> to vector<2x8x8xbf16>
    %45 = vector.extract_strided_slice %41 {offsets = [0, 0, 64], sizes = [2, 8, 8], strides = [1, 1, 1]} : vector<2x8x96xbf16> to vector<2x8x8xbf16>
    "tpu.trace_start"() <{level = 10 : i32, message = "btd,bsd->bts"}> : () -> ()
    %cst_22 = arith.constant dense<0.000000e+00> : vector<2x8x8xf32>
    %46 = tpu.matmul %43, %44, %cst_22 {dimension_numbers = #tpu.dot_dimension_numbers<[2], [2], [1], [1], [0, 0, 0, 1, 1, 1], [0], [0]>} : vector<2x8x8xbf16>, vector<2x8x8xbf16>, vector<2x8x8xf32> -> vector<2x8x8xf32>
    "tpu.trace_stop"() : () -> ()
    %cst_23 = arith.constant 0.353553385 : f32
    %47 = vector.broadcast %cst_23 : f32 to vector<2x8x8xf32>
    %48 = arith.mulf %46, %47 : vector<2x8x8xf32>
    %cst_24 = arith.constant dense<0xFF800000> : vector<2x8xf32>
    %49 = vector.multi_reduction <maximumf>, %48, %cst_24 [2] : vector<2x8x8xf32> to vector<2x8xf32>
    %50 = vector.shape_cast %49 : vector<2x8xf32> to vector<2x8x1xf32>
    %51 = vector.broadcast %50 : vector<2x8x1xf32> to vector<2x8x8xf32>
    %52 = arith.subf %48, %51 : vector<2x8x8xf32>
    %53 = math.exp %52 : vector<2x8x8xf32>
    %cst_25 = arith.constant dense<0.000000e+00> : vector<2x8xf32>
    %54 = vector.multi_reduction <add>, %53, %cst_25 [2] : vector<2x8x8xf32> to vector<2x8xf32>
    %55 = vector.shape_cast %54 : vector<2x8xf32> to vector<2x8x1xf32>
    %56 = tpu.reciprocal %55 {approx = true} : vector<2x8x1xf32> -> vector<2x8x1xf32>
    %57 = vector.broadcast %56 : vector<2x8x1xf32> to vector<2x8x8xf32>
    %58 = arith.mulf %53, %57 : vector<2x8x8xf32>
    %59 = arith.truncf %58 : vector<2x8x8xf32> to vector<2x8x8xbf16>
    "tpu.trace_start"() <{level = 10 : i32, message = "bts,bsd->btd"}> : () -> ()
    %cst_26 = arith.constant dense<0.000000e+00> : vector<2x8x8xf32>
    %60 = tpu.matmul %59, %45, %cst_26 {dimension_numbers = #tpu.dot_dimension_numbers<[2], [1], [1], [2], [0, 0, 0, 1, 1, 2], [0], [0]>} : vector<2x8x8xbf16>, vector<2x8x8xbf16>, vector<2x8x8xf32> -> vector<2x8x8xf32>
    "tpu.trace_stop"() : () -> ()
    %61 = vector.shape_cast %60 : vector<2x8x8xf32> to vector<16x8xf32>
    %62 = arith.truncf %61 : vector<16x8xf32> to vector<16x8xbf16>
    %c0_27 = arith.constant 0 : index
    %c0_28 = arith.constant 0 : index
    %c0_29 = arith.constant 0 : index
    %63 = vector.load %arg4[%c0_27, %c0_28, %c0_29] : memref<2x32x32xbf16, #tpu.memory_space<vmem>>, vector<1x8x32xbf16>
    %64 = vector.shape_cast %63 : vector<1x8x32xbf16> to vector<8x32xbf16>
    %cst_30 = arith.constant dense<0.000000e+00> : vector<16x32xf32>
    %65 = tpu.matmul %62, %64, %cst_30 {dimension_numbers = #tpu.dot_dimension_numbers<[1], [0], [0], [1], [0, 0, 1, 1], [], []>} : vector<16x8xbf16>, vector<8x32xbf16>, vector<16x32xf32> -> vector<16x32xf32>
    %66 = arith.addf %42, %65 : vector<16x32xf32>
    %67 = vector.extract_strided_slice %41 {offsets = [0, 0, 8], sizes = [2, 8, 8], strides = [1, 1, 1]} : vector<2x8x96xbf16> to vector<2x8x8xbf16>
    %68 = vector.extract_strided_slice %41 {offsets = [0, 0, 40], sizes = [2, 8, 8], strides = [1, 1, 1]} : vector<2x8x96xbf16> to vector<2x8x8xbf16>
    %69 = vector.extract_strided_slice %41 {offsets = [0, 0, 72], sizes = [2, 8, 8], strides = [1, 1, 1]} : vector<2x8x96xbf16> to vector<2x8x8xbf16>
    "tpu.trace_start"() <{level = 10 : i32, message = "btd,bsd->bts"}> : () -> ()
    %cst_31 = arith.constant dense<0.000000e+00> : vector<2x8x8xf32>
    %70 = tpu.matmul %67, %68, %cst_31 {dimension_numbers = #tpu.dot_dimension_numbers<[2], [2], [1], [1], [0, 0, 0, 1, 1, 1], [0], [0]>} : vector<2x8x8xbf16>, vector<2x8x8xbf16>, vector<2x8x8xf32> -> vector<2x8x8xf32>
    "tpu.trace_stop"() : () -> ()
    %cst_32 = arith.constant 0.353553385 : f32
    %71 = vector.broadcast %cst_32 : f32 to vector<2x8x8xf32>
    %72 = arith.mulf %70, %71 : vector<2x8x8xf32>
    %cst_33 = arith.constant dense<0xFF800000> : vector<2x8xf32>
    %73 = vector.multi_reduction <maximumf>, %72, %cst_33 [2] : vector<2x8x8xf32> to vector<2x8xf32>
    %74 = vector.shape_cast %73 : vector<2x8xf32> to vector<2x8x1xf32>
    %75 = vector.broadcast %74 : vector<2x8x1xf32> to vector<2x8x8xf32>
    %76 = arith.subf %72, %75 : vector<2x8x8xf32>
    %77 = math.exp %76 : vector<2x8x8xf32>
    %cst_34 = arith.constant dense<0.000000e+00> : vector<2x8xf32>
    %78 = vector.multi_reduction <add>, %77, %cst_34 [2] : vector<2x8x8xf32> to vector<2x8xf32>
    %79 = vector.shape_cast %78 : vector<2x8xf32> to vector<2x8x1xf32>
    %80 = tpu.reciprocal %79 {approx = true} : vector<2x8x1xf32> -> vector<2x8x1xf32>
    %81 = vector.broadcast %80 : vector<2x8x1xf32> to vector<2x8x8xf32>
    %82 = arith.mulf %77, %81 : vector<2x8x8xf32>
    %83 = arith.truncf %82 : vector<2x8x8xf32> to vector<2x8x8xbf16>
    "tpu.trace_start"() <{level = 10 : i32, message = "bts,bsd->btd"}> : () -> ()
    %cst_35 = arith.constant dense<0.000000e+00> : vector<2x8x8xf32>
    %84 = tpu.matmul %83, %69, %cst_35 {dimension_numbers = #tpu.dot_dimension_numbers<[2], [1], [1], [2], [0, 0, 0, 1, 1, 2], [0], [0]>} : vector<2x8x8xbf16>, vector<2x8x8xbf16>, vector<2x8x8xf32> -> vector<2x8x8xf32>
    "tpu.trace_stop"() : () -> ()
    %85 = vector.shape_cast %84 : vector<2x8x8xf32> to vector<16x8xf32>
    %86 = arith.truncf %85 : vector<16x8xf32> to vector<16x8xbf16>
    %c0_36 = arith.constant 0 : index
    %c8 = arith.constant 8 : index
    %c0_37 = arith.constant 0 : index
    %87 = vector.load %arg4[%c0_36, %c8, %c0_37] : memref<2x32x32xbf16, #tpu.memory_space<vmem>>, vector<1x8x32xbf16>
    %88 = vector.shape_cast %87 : vector<1x8x32xbf16> to vector<8x32xbf16>
    %cst_38 = arith.constant dense<0.000000e+00> : vector<16x32xf32>
    %89 = tpu.matmul %86, %88, %cst_38 {dimension_numbers = #tpu.dot_dimension_numbers<[1], [0], [0], [1], [0, 0, 1, 1], [], []>} : vector<16x8xbf16>, vector<8x32xbf16>, vector<16x32xf32> -> vector<16x32xf32>
    %90 = arith.addf %66, %89 : vector<16x32xf32>
    %91 = vector.extract_strided_slice %41 {offsets = [0, 0, 16], sizes = [2, 8, 8], strides = [1, 1, 1]} : vector<2x8x96xbf16> to vector<2x8x8xbf16>
    %92 = vector.extract_strided_slice %41 {offsets = [0, 0, 48], sizes = [2, 8, 8], strides = [1, 1, 1]} : vector<2x8x96xbf16> to vector<2x8x8xbf16>
    %93 = vector.extract_strided_slice %41 {offsets = [0, 0, 80], sizes = [2, 8, 8], strides = [1, 1, 1]} : vector<2x8x96xbf16> to vector<2x8x8xbf16>
    "tpu.trace_start"() <{level = 10 : i32, message = "btd,bsd->bts"}> : () -> ()
    %cst_39 = arith.constant dense<0.000000e+00> : vector<2x8x8xf32>
    %94 = tpu.matmul %91, %92, %cst_39 {dimension_numbers = #tpu.dot_dimension_numbers<[2], [2], [1], [1], [0, 0, 0, 1, 1, 1], [0], [0]>} : vector<2x8x8xbf16>, vector<2x8x8xbf16>, vector<2x8x8xf32> -> vector<2x8x8xf32>
    "tpu.trace_stop"() : () -> ()
    %cst_40 = arith.constant 0.353553385 : f32
    %95 = vector.broadcast %cst_40 : f32 to vector<2x8x8xf32>
    %96 = arith.mulf %94, %95 : vector<2x8x8xf32>
    %cst_41 = arith.constant dense<0xFF800000> : vector<2x8xf32>
    %97 = vector.multi_reduction <maximumf>, %96, %cst_41 [2] : vector<2x8x8xf32> to vector<2x8xf32>
    %98 = vector.shape_cast %97 : vector<2x8xf32> to vector<2x8x1xf32>
    %99 = vector.broadcast %98 : vector<2x8x1xf32> to vector<2x8x8xf32>
    %100 = arith.subf %96, %99 : vector<2x8x8xf32>
    %101 = math.exp %100 : vector<2x8x8xf32>
    %cst_42 = arith.constant dense<0.000000e+00> : vector<2x8xf32>
    %102 = vector.multi_reduction <add>, %101, %cst_42 [2] : vector<2x8x8xf32> to vector<2x8xf32>
    %103 = vector.shape_cast %102 : vector<2x8xf32> to vector<2x8x1xf32>
    %104 = tpu.reciprocal %103 {approx = true} : vector<2x8x1xf32> -> vector<2x8x1xf32>
    %105 = vector.broadcast %104 : vector<2x8x1xf32> to vector<2x8x8xf32>
    %106 = arith.mulf %101, %105 : vector<2x8x8xf32>
    %107 = arith.truncf %106 : vector<2x8x8xf32> to vector<2x8x8xbf16>
    "tpu.trace_start"() <{level = 10 : i32, message = "bts,bsd->btd"}> : () -> ()
    %cst_43 = arith.constant dense<0.000000e+00> : vector<2x8x8xf32>
    %108 = tpu.matmul %107, %93, %cst_43 {dimension_numbers = #tpu.dot_dimension_numbers<[2], [1], [1], [2], [0, 0, 0, 1, 1, 2], [0], [0]>} : vector<2x8x8xbf16>, vector<2x8x8xbf16>, vector<2x8x8xf32> -> vector<2x8x8xf32>
    "tpu.trace_stop"() : () -> ()
    %109 = vector.shape_cast %108 : vector<2x8x8xf32> to vector<16x8xf32>
    %110 = arith.truncf %109 : vector<16x8xf32> to vector<16x8xbf16>
    %c0_44 = arith.constant 0 : index
    %c16 = arith.constant 16 : index
    %c0_45 = arith.constant 0 : index
    %111 = vector.load %arg4[%c0_44, %c16, %c0_45] : memref<2x32x32xbf16, #tpu.memory_space<vmem>>, vector<1x8x32xbf16>
    %112 = vector.shape_cast %111 : vector<1x8x32xbf16> to vector<8x32xbf16>
    %cst_46 = arith.constant dense<0.000000e+00> : vector<16x32xf32>
    %113 = tpu.matmul %110, %112, %cst_46 {dimension_numbers = #tpu.dot_dimension_numbers<[1], [0], [0], [1], [0, 0, 1, 1], [], []>} : vector<16x8xbf16>, vector<8x32xbf16>, vector<16x32xf32> -> vector<16x32xf32>
    %114 = arith.addf %90, %113 : vector<16x32xf32>
    %115 = vector.extract_strided_slice %41 {offsets = [0, 0, 24], sizes = [2, 8, 8], strides = [1, 1, 1]} : vector<2x8x96xbf16> to vector<2x8x8xbf16>
    %116 = vector.extract_strided_slice %41 {offsets = [0, 0, 56], sizes = [2, 8, 8], strides = [1, 1, 1]} : vector<2x8x96xbf16> to vector<2x8x8xbf16>
    %117 = vector.extract_strided_slice %41 {offsets = [0, 0, 88], sizes = [2, 8, 8], strides = [1, 1, 1]} : vector<2x8x96xbf16> to vector<2x8x8xbf16>
    "tpu.trace_start"() <{level = 10 : i32, message = "btd,bsd->bts"}> : () -> ()
    %cst_47 = arith.constant dense<0.000000e+00> : vector<2x8x8xf32>
    %118 = tpu.matmul %115, %116, %cst_47 {dimension_numbers = #tpu.dot_dimension_numbers<[2], [2], [1], [1], [0, 0, 0, 1, 1, 1], [0], [0]>} : vector<2x8x8xbf16>, vector<2x8x8xbf16>, vector<2x8x8xf32> -> vector<2x8x8xf32>
    "tpu.trace_stop"() : () -> ()
    %cst_48 = arith.constant 0.353553385 : f32
    %119 = vector.broadcast %cst_48 : f32 to vector<2x8x8xf32>
    %120 = arith.mulf %118, %119 : vector<2x8x8xf32>
    %cst_49 = arith.constant dense<0xFF800000> : vector<2x8xf32>
    %121 = vector.multi_reduction <maximumf>, %120, %cst_49 [2] : vector<2x8x8xf32> to vector<2x8xf32>
    %122 = vector.shape_cast %121 : vector<2x8xf32> to vector<2x8x1xf32>
    %123 = vector.broadcast %122 : vector<2x8x1xf32> to vector<2x8x8xf32>
    %124 = arith.subf %120, %123 : vector<2x8x8xf32>
    %125 = math.exp %124 : vector<2x8x8xf32>
    %cst_50 = arith.constant dense<0.000000e+00> : vector<2x8xf32>
    %126 = vector.multi_reduction <add>, %125, %cst_50 [2] : vector<2x8x8xf32> to vector<2x8xf32>
    %127 = vector.shape_cast %126 : vector<2x8xf32> to vector<2x8x1xf32>
    %128 = tpu.reciprocal %127 {approx = true} : vector<2x8x1xf32> -> vector<2x8x1xf32>
    %129 = vector.broadcast %128 : vector<2x8x1xf32> to vector<2x8x8xf32>
    %130 = arith.mulf %125, %129 : vector<2x8x8xf32>
    %131 = arith.truncf %130 : vector<2x8x8xf32> to vector<2x8x8xbf16>
    "tpu.trace_start"() <{level = 10 : i32, message = "bts,bsd->btd"}> : () -> ()
    %cst_51 = arith.constant dense<0.000000e+00> : vector<2x8x8xf32>
    %132 = tpu.matmul %131, %117, %cst_51 {dimension_numbers = #tpu.dot_dimension_numbers<[2], [1], [1], [2], [0, 0, 0, 1, 1, 2], [0], [0]>} : vector<2x8x8xbf16>, vector<2x8x8xbf16>, vector<2x8x8xf32> -> vector<2x8x8xf32>
    "tpu.trace_stop"() : () -> ()
    %133 = vector.shape_cast %132 : vector<2x8x8xf32> to vector<16x8xf32>
    %134 = arith.truncf %133 : vector<16x8xf32> to vector<16x8xbf16>
    %c0_52 = arith.constant 0 : index
    %c24 = arith.constant 24 : index
    %c0_53 = arith.constant 0 : index
    %135 = vector.load %arg4[%c0_52, %c24, %c0_53] : memref<2x32x32xbf16, #tpu.memory_space<vmem>>, vector<1x8x32xbf16>
    %136 = vector.shape_cast %135 : vector<1x8x32xbf16> to vector<8x32xbf16>
    %cst_54 = arith.constant dense<0.000000e+00> : vector<16x32xf32>
    %137 = tpu.matmul %134, %136, %cst_54 {dimension_numbers = #tpu.dot_dimension_numbers<[1], [0], [0], [1], [0, 0, 1, 1], [], []>} : vector<16x8xbf16>, vector<8x32xbf16>, vector<16x32xf32> -> vector<16x32xf32>
    %138 = arith.addf %114, %137 : vector<16x32xf32>
    %139 = arith.addf %1, %138 : vector<16x32xf32>
    %c0_55 = arith.constant 0 : index
    %c0_56 = arith.constant 0 : index
    %c96 = arith.constant 96 : index
    %140 = vector.load %arg7[%c0_55, %c0_56, %c96] : memref<2x1x352xf32, #tpu.memory_space<vmem>>, vector<1x1x32xf32>
    %141 = vector.shape_cast %140 : vector<1x1x32xf32> to vector<1x32xf32>
    %142 = vector.broadcast %141 : vector<1x32xf32> to vector<16x32xf32>
    %143 = arith.addf %139, %142 : vector<16x32xf32>
    %c0_57 = arith.constant 0 : index
    %c0_58 = arith.constant 0 : index
    %c128 = arith.constant 128 : index
    %144 = vector.load %arg7[%c0_57, %c0_58, %c128] : memref<2x1x352xf32, #tpu.memory_space<vmem>>, vector<1x1x32xf32>
    %145 = vector.shape_cast %144 : vector<1x1x32xf32> to vector<1x32xf32>
    %c0_59 = arith.constant 0 : index
    %c0_60 = arith.constant 0 : index
    %c160 = arith.constant 160 : index
    %146 = vector.load %arg7[%c0_59, %c0_60, %c160] : memref<2x1x352xf32, #tpu.memory_space<vmem>>, vector<1x1x32xf32>
    %147 = vector.shape_cast %146 : vector<1x1x32xf32> to vector<1x32xf32>
    %cst_61 = arith.constant dense<0.000000e+00> : vector<16xf32>
    %148 = vector.multi_reduction <add>, %143, %cst_61 [1] : vector<16x32xf32> to vector<16xf32>
    %149 = vector.shape_cast %148 : vector<16xf32> to vector<16x1xf32>
    %cst_62 = arith.constant 3.200000e+01 : f32
    %150 = vector.broadcast %cst_62 : f32 to vector<16x1xf32>
    %151 = arith.divf %149, %150 : vector<16x1xf32>
    %152 = vector.broadcast %151 : vector<16x1xf32> to vector<16x32xf32>
    %153 = arith.subf %143, %152 : vector<16x32xf32>
    %154 = arith.mulf %153, %153 : vector<16x32xf32>
    %cst_63 = arith.constant dense<0.000000e+00> : vector<16xf32>
    %155 = vector.multi_reduction <add>, %154, %cst_63 [1] : vector<16x32xf32> to vector<16xf32>
    %156 = vector.shape_cast %155 : vector<16xf32> to vector<16x1xf32>
    %cst_64 = arith.constant 3.200000e+01 : f32
    %157 = vector.broadcast %cst_64 : f32 to vector<16x1xf32>
    %158 = arith.divf %156, %157 : vector<16x1xf32>
    %159 = vector.broadcast %151 : vector<16x1xf32> to vector<16x32xf32>
    %160 = arith.subf %143, %159 : vector<16x32xf32>
    %cst_65 = arith.constant 9.99999974E-6 : f32
    %161 = vector.broadcast %cst_65 : f32 to vector<16x1xf32>
    %162 = arith.addf %158, %161 : vector<16x1xf32>
    %163 = math.rsqrt %162 : vector<16x1xf32>
    %164 = vector.broadcast %163 : vector<16x1xf32> to vector<16x32xf32>
    %165 = arith.mulf %160, %164 : vector<16x32xf32>
    %166 = vector.broadcast %145 : vector<1x32xf32> to vector<16x32xf32>
    %167 = arith.mulf %165, %166 : vector<16x32xf32>
    %168 = vector.broadcast %147 : vector<1x32xf32> to vector<16x32xf32>
    %169 = arith.addf %167, %168 : vector<16x32xf32>
    %170 = arith.truncf %169 : vector<16x32xf32> to vector<16x32xbf16>
    %c0_66 = arith.constant 0 : index
    %c0_67 = arith.constant 0 : index
    %c0_68 = arith.constant 0 : index
    %171 = vector.load %arg5[%c0_66, %c0_67, %c0_68] : memref<2x32x128xbf16, #tpu.memory_space<vmem>>, vector<1x32x128xbf16>
    %172 = vector.shape_cast %171 : vector<1x32x128xbf16> to vector<32x128xbf16>
    %cst_69 = arith.constant dense<0.000000e+00> : vector<16x128xf32>
    %173 = tpu.matmul %170, %172, %cst_69 {dimension_numbers = #tpu.dot_dimension_numbers<[1], [0], [0], [1], [0, 0, 1, 1], [], []>} : vector<16x32xbf16>, vector<32x128xbf16>, vector<16x128xf32> -> vector<16x128xf32>
    %c0_70 = arith.constant 0 : index
    %c0_71 = arith.constant 0 : index
    %c192 = arith.constant 192 : index
    %174 = vector.load %arg7[%c0_70, %c0_71, %c192] : memref<2x1x352xf32, #tpu.memory_space<vmem>>, vector<1x1x128xf32>
    %175 = vector.shape_cast %174 : vector<1x1x128xf32> to vector<1x128xf32>
    %176 = vector.broadcast %175 : vector<1x128xf32> to vector<16x128xf32>
    %177 = arith.addf %173, %176 : vector<16x128xf32>
    %cst_72 = arith.constant 5.000000e-01 : f32
    %178 = vector.broadcast %cst_72 : f32 to vector<16x128xf32>
    %179 = arith.mulf %178, %177 : vector<16x128xf32>
    %cst_73 = arith.constant 0.707106769 : f32
    %180 = vector.broadcast %cst_73 : f32 to vector<16x128xf32>
    %181 = arith.mulf %177, %180 : vector<16x128xf32>
    %cst_74 = arith.constant 0.000000e+00 : f32
    %182 = vector.broadcast %cst_74 : f32 to vector<16x128xf32>
    %183 = arith.cmpf oge, %181, %182 : vector<16x128xf32>
    %cst_75 = arith.constant 1.000000e+00 : f32
    %cst_76 = arith.constant -1.000000e+00 : f32
    %184 = vector.broadcast %cst_75 : f32 to vector<16x128xf32>
    %185 = vector.broadcast %cst_76 : f32 to vector<16x128xf32>
    %186 = arith.select %183, %184, %185 : vector<16x128xi1>, vector<16x128xf32>
    %187 = math.absf %181 : vector<16x128xf32>
    %cst_77 = arith.constant 0.327591091 : f32
    %188 = vector.broadcast %cst_77 : f32 to vector<16x128xf32>
    %189 = arith.mulf %188, %187 : vector<16x128xf32>
    %cst_78 = arith.constant 1.000000e+00 : f32
    %190 = vector.broadcast %cst_78 : f32 to vector<16x128xf32>
    %191 = arith.addf %190, %189 : vector<16x128xf32>
    %192 = tpu.reciprocal %191 {approx = true} : vector<16x128xf32> -> vector<16x128xf32>
    %cst_79 = arith.constant 1.06140542 : f32
    %193 = vector.broadcast %cst_79 : f32 to vector<16x128xf32>
    %194 = arith.mulf %193, %192 : vector<16x128xf32>
    %cst_80 = arith.constant -1.45315206 : f32
    %195 = vector.broadcast %cst_80 : f32 to vector<16x128xf32>
    %196 = arith.addf %194, %195 : vector<16x128xf32>
    %197 = arith.mulf %196, %192 : vector<16x128xf32>
    %cst_81 = arith.constant 1.42141378 : f32
    %198 = vector.broadcast %cst_81 : f32 to vector<16x128xf32>
    %199 = arith.addf %197, %198 : vector<16x128xf32>
    %200 = arith.mulf %199, %192 : vector<16x128xf32>
    %cst_82 = arith.constant -0.284496725 : f32
    %201 = vector.broadcast %cst_82 : f32 to vector<16x128xf32>
    %202 = arith.addf %200, %201 : vector<16x128xf32>
    %203 = arith.mulf %202, %192 : vector<16x128xf32>
    %cst_83 = arith.constant 0.254829586 : f32
    %204 = vector.broadcast %cst_83 : f32 to vector<16x128xf32>
    %205 = arith.addf %203, %204 : vector<16x128xf32>
    %206 = arith.mulf %205, %192 : vector<16x128xf32>
    %cst_84 = arith.constant 0.000000e+00 : f32
    %207 = vector.broadcast %cst_84 : f32 to vector<16x128xf32>
    %208 = arith.subf %207, %187 : vector<16x128xf32>
    %209 = arith.mulf %208, %187 : vector<16x128xf32>
    %210 = math.exp %209 : vector<16x128xf32>
    %211 = arith.mulf %206, %210 : vector<16x128xf32>
    %cst_85 = arith.constant 1.000000e+00 : f32
    %212 = vector.broadcast %cst_85 : f32 to vector<16x128xf32>
    %213 = arith.subf %212, %211 : vector<16x128xf32>
    %214 = arith.mulf %186, %213 : vector<16x128xf32>
    %cst_86 = arith.constant 1.000000e+00 : f32
    %215 = vector.broadcast %cst_86 : f32 to vector<16x128xf32>
    %216 = arith.addf %215, %214 : vector<16x128xf32>
    %217 = arith.mulf %179, %216 : vector<16x128xf32>
    %218 = arith.truncf %217 : vector<16x128xf32> to vector<16x128xbf16>
    %c0_87 = arith.constant 0 : index
    %c0_88 = arith.constant 0 : index
    %c0_89 = arith.constant 0 : index
    %219 = vector.load %arg6[%c0_87, %c0_88, %c0_89] : memref<2x128x32xbf16, #tpu.memory_space<vmem>>, vector<1x128x32xbf16>
    %220 = vector.shape_cast %219 : vector<1x128x32xbf16> to vector<128x32xbf16>
    %cst_90 = arith.constant dense<0.000000e+00> : vector<16x32xf32>
    %221 = tpu.matmul %218, %220, %cst_90 {dimension_numbers = #tpu.dot_dimension_numbers<[1], [0], [0], [1], [0, 0, 1, 1], [], []>} : vector<16x128xbf16>, vector<128x32xbf16>, vector<16x32xf32> -> vector<16x32xf32>
    %c0_91 = arith.constant 0 : index
    %c0_92 = arith.constant 0 : index
    %c320 = arith.constant 320 : index
    %222 = vector.load %arg7[%c0_91, %c0_92, %c320] : memref<2x1x352xf32, #tpu.memory_space<vmem>>, vector<1x1x32xf32>
    %223 = vector.shape_cast %222 : vector<1x1x32xf32> to vector<1x32xf32>
    %224 = vector.broadcast %223 : vector<1x32xf32> to vector<16x32xf32>
    %225 = arith.addf %221, %224 : vector<16x32xf32>
    %226 = arith.addf %143, %225 : vector<16x32xf32>
    %c1 = arith.constant 1 : index
    %c0_93 = arith.constant 0 : index
    %c0_94 = arith.constant 0 : index
    %c0_95 = arith.constant 0 : index
    %227 = vector.load %arg1[%c1, %c0_93, %c0_94, %c0_95] : memref<2x2x1x64xf32, #tpu.memory_space<vmem>>, vector<1x2x1x32xf32>
    %228 = vector.shape_cast %227 : vector<1x2x1x32xf32> to vector<2x1x32xf32>
    %c1_96 = arith.constant 1 : index
    %c0_97 = arith.constant 0 : index
    %c0_98 = arith.constant 0 : index
    %c32_99 = arith.constant 32 : index
    %229 = vector.load %arg1[%c1_96, %c0_97, %c0_98, %c32_99] : memref<2x2x1x64xf32, #tpu.memory_space<vmem>>, vector<1x2x1x32xf32>
    %230 = vector.shape_cast %229 : vector<1x2x1x32xf32> to vector<2x1x32xf32>
    %cst_100 = arith.constant dense<0.000000e+00> : vector<16xf32>
    %231 = vector.multi_reduction <add>, %226, %cst_100 [1] : vector<16x32xf32> to vector<16xf32>
    %232 = vector.shape_cast %231 : vector<16xf32> to vector<16x1xf32>
    %cst_101 = arith.constant 3.200000e+01 : f32
    %233 = vector.broadcast %cst_101 : f32 to vector<16x1xf32>
    %234 = arith.divf %232, %233 : vector<16x1xf32>
    %235 = vector.broadcast %234 : vector<16x1xf32> to vector<16x32xf32>
    %236 = arith.subf %226, %235 : vector<16x32xf32>
    %237 = arith.mulf %236, %236 : vector<16x32xf32>
    %cst_102 = arith.constant dense<0.000000e+00> : vector<16xf32>
    %238 = vector.multi_reduction <add>, %237, %cst_102 [1] : vector<16x32xf32> to vector<16xf32>
    %239 = vector.shape_cast %238 : vector<16xf32> to vector<16x1xf32>
    %cst_103 = arith.constant 3.200000e+01 : f32
    %240 = vector.broadcast %cst_103 : f32 to vector<16x1xf32>
    %241 = arith.divf %239, %240 : vector<16x1xf32>
    %242 = vector.broadcast %234 : vector<16x1xf32> to vector<16x32xf32>
    %243 = arith.subf %226, %242 : vector<16x32xf32>
    %cst_104 = arith.constant 9.99999974E-6 : f32
    %244 = vector.broadcast %cst_104 : f32 to vector<16x1xf32>
    %245 = arith.addf %241, %244 : vector<16x1xf32>
    %246 = math.rsqrt %245 : vector<16x1xf32>
    %247 = vector.broadcast %246 : vector<16x1xf32> to vector<16x32xf32>
    %248 = arith.mulf %243, %247 : vector<16x32xf32>
    %249 = vector.shape_cast %248 : vector<16x32xf32> to vector<2x8x32xf32>
    %cst_105 = arith.constant 1.000000e+00 : f32
    %250 = vector.broadcast %cst_105 : f32 to vector<2x1x32xf32>
    %251 = arith.addf %250, %228 : vector<2x1x32xf32>
    %252 = vector.broadcast %251 : vector<2x1x32xf32> to vector<2x8x32xf32>
    %253 = arith.mulf %249, %252 : vector<2x8x32xf32>
    %254 = vector.broadcast %230 : vector<2x1x32xf32> to vector<2x8x32xf32>
    %255 = arith.addf %253, %254 : vector<2x8x32xf32>
    %256 = vector.shape_cast %255 : vector<2x8x32xf32> to vector<16x32xf32>
    %257 = arith.truncf %256 : vector<16x32xf32> to vector<16x32xbf16>
    %c1_106 = arith.constant 1 : index
    %c0_107 = arith.constant 0 : index
    %c0_108 = arith.constant 0 : index
    %258 = vector.load %arg7[%c1_106, %c0_107, %c0_108] : memref<2x1x352xf32, #tpu.memory_space<vmem>>, vector<1x1x96xf32>
    %259 = vector.shape_cast %258 : vector<1x1x96xf32> to vector<1x96xf32>
    %c1_109 = arith.constant 1 : index
    %c0_110 = arith.constant 0 : index
    %c0_111 = arith.constant 0 : index
    %260 = vector.load %arg3[%c1_109, %c0_110, %c0_111] : memref<2x32x96xbf16, #tpu.memory_space<vmem>>, vector<1x32x96xbf16>
    %261 = vector.shape_cast %260 : vector<1x32x96xbf16> to vector<32x96xbf16>
    %cst_112 = arith.constant dense<0.000000e+00> : vector<16x96xf32>
    %262 = tpu.matmul %257, %261, %cst_112 {dimension_numbers = #tpu.dot_dimension_numbers<[1], [0], [0], [1], [0, 0, 1, 1], [], []>} : vector<16x32xbf16>, vector<32x96xbf16>, vector<16x96xf32> -> vector<16x96xf32>
    %263 = vector.broadcast %259 : vector<1x96xf32> to vector<16x96xf32>
    %264 = arith.addf %262, %263 : vector<16x96xf32>
    %265 = vector.shape_cast %264 : vector<16x96xf32> to vector<2x8x96xf32>
    %266 = arith.truncf %265 : vector<2x8x96xf32> to vector<2x8x96xbf16>
    %cst_113 = arith.constant 0.000000e+00 : f32
    %267 = vector.broadcast %cst_113 : f32 to vector<16x32xf32>
    %268 = vector.extract_strided_slice %266 {offsets = [0, 0, 0], sizes = [2, 8, 8], strides = [1, 1, 1]} : vector<2x8x96xbf16> to vector<2x8x8xbf16>
    %269 = vector.extract_strided_slice %266 {offsets = [0, 0, 32], sizes = [2, 8, 8], strides = [1, 1, 1]} : vector<2x8x96xbf16> to vector<2x8x8xbf16>
    %270 = vector.extract_strided_slice %266 {offsets = [0, 0, 64], sizes = [2, 8, 8], strides = [1, 1, 1]} : vector<2x8x96xbf16> to vector<2x8x8xbf16>
    "tpu.trace_start"() <{level = 10 : i32, message = "btd,bsd->bts"}> : () -> ()
    %cst_114 = arith.constant dense<0.000000e+00> : vector<2x8x8xf32>
    %271 = tpu.matmul %268, %269, %cst_114 {dimension_numbers = #tpu.dot_dimension_numbers<[2], [2], [1], [1], [0, 0, 0, 1, 1, 1], [0], [0]>} : vector<2x8x8xbf16>, vector<2x8x8xbf16>, vector<2x8x8xf32> -> vector<2x8x8xf32>
    "tpu.trace_stop"() : () -> ()
    %cst_115 = arith.constant 0.353553385 : f32
    %272 = vector.broadcast %cst_115 : f32 to vector<2x8x8xf32>
    %273 = arith.mulf %271, %272 : vector<2x8x8xf32>
    %cst_116 = arith.constant dense<0xFF800000> : vector<2x8xf32>
    %274 = vector.multi_reduction <maximumf>, %273, %cst_116 [2] : vector<2x8x8xf32> to vector<2x8xf32>
    %275 = vector.shape_cast %274 : vector<2x8xf32> to vector<2x8x1xf32>
    %276 = vector.broadcast %275 : vector<2x8x1xf32> to vector<2x8x8xf32>
    %277 = arith.subf %273, %276 : vector<2x8x8xf32>
    %278 = math.exp %277 : vector<2x8x8xf32>
    %cst_117 = arith.constant dense<0.000000e+00> : vector<2x8xf32>
    %279 = vector.multi_reduction <add>, %278, %cst_117 [2] : vector<2x8x8xf32> to vector<2x8xf32>
    %280 = vector.shape_cast %279 : vector<2x8xf32> to vector<2x8x1xf32>
    %281 = tpu.reciprocal %280 {approx = true} : vector<2x8x1xf32> -> vector<2x8x1xf32>
    %282 = vector.broadcast %281 : vector<2x8x1xf32> to vector<2x8x8xf32>
    %283 = arith.mulf %278, %282 : vector<2x8x8xf32>
    %284 = arith.truncf %283 : vector<2x8x8xf32> to vector<2x8x8xbf16>
    "tpu.trace_start"() <{level = 10 : i32, message = "bts,bsd->btd"}> : () -> ()
    %cst_118 = arith.constant dense<0.000000e+00> : vector<2x8x8xf32>
    %285 = tpu.matmul %284, %270, %cst_118 {dimension_numbers = #tpu.dot_dimension_numbers<[2], [1], [1], [2], [0, 0, 0, 1, 1, 2], [0], [0]>} : vector<2x8x8xbf16>, vector<2x8x8xbf16>, vector<2x8x8xf32> -> vector<2x8x8xf32>
    "tpu.trace_stop"() : () -> ()
    %286 = vector.shape_cast %285 : vector<2x8x8xf32> to vector<16x8xf32>
    %287 = arith.truncf %286 : vector<16x8xf32> to vector<16x8xbf16>
    %c1_119 = arith.constant 1 : index
    %c0_120 = arith.constant 0 : index
    %c0_121 = arith.constant 0 : index
    %288 = vector.load %arg4[%c1_119, %c0_120, %c0_121] : memref<2x32x32xbf16, #tpu.memory_space<vmem>>, vector<1x8x32xbf16>
    %289 = vector.shape_cast %288 : vector<1x8x32xbf16> to vector<8x32xbf16>
    %cst_122 = arith.constant dense<0.000000e+00> : vector<16x32xf32>
    %290 = tpu.matmul %287, %289, %cst_122 {dimension_numbers = #tpu.dot_dimension_numbers<[1], [0], [0], [1], [0, 0, 1, 1], [], []>} : vector<16x8xbf16>, vector<8x32xbf16>, vector<16x32xf32> -> vector<16x32xf32>
    %291 = arith.addf %267, %290 : vector<16x32xf32>
    %292 = vector.extract_strided_slice %266 {offsets = [0, 0, 8], sizes = [2, 8, 8], strides = [1, 1, 1]} : vector<2x8x96xbf16> to vector<2x8x8xbf16>
    %293 = vector.extract_strided_slice %266 {offsets = [0, 0, 40], sizes = [2, 8, 8], strides = [1, 1, 1]} : vector<2x8x96xbf16> to vector<2x8x8xbf16>
    %294 = vector.extract_strided_slice %266 {offsets = [0, 0, 72], sizes = [2, 8, 8], strides = [1, 1, 1]} : vector<2x8x96xbf16> to vector<2x8x8xbf16>
    "tpu.trace_start"() <{level = 10 : i32, message = "btd,bsd->bts"}> : () -> ()
    %cst_123 = arith.constant dense<0.000000e+00> : vector<2x8x8xf32>
    %295 = tpu.matmul %292, %293, %cst_123 {dimension_numbers = #tpu.dot_dimension_numbers<[2], [2], [1], [1], [0, 0, 0, 1, 1, 1], [0], [0]>} : vector<2x8x8xbf16>, vector<2x8x8xbf16>, vector<2x8x8xf32> -> vector<2x8x8xf32>
    "tpu.trace_stop"() : () -> ()
    %cst_124 = arith.constant 0.353553385 : f32
    %296 = vector.broadcast %cst_124 : f32 to vector<2x8x8xf32>
    %297 = arith.mulf %295, %296 : vector<2x8x8xf32>
    %cst_125 = arith.constant dense<0xFF800000> : vector<2x8xf32>
    %298 = vector.multi_reduction <maximumf>, %297, %cst_125 [2] : vector<2x8x8xf32> to vector<2x8xf32>
    %299 = vector.shape_cast %298 : vector<2x8xf32> to vector<2x8x1xf32>
    %300 = vector.broadcast %299 : vector<2x8x1xf32> to vector<2x8x8xf32>
    %301 = arith.subf %297, %300 : vector<2x8x8xf32>
    %302 = math.exp %301 : vector<2x8x8xf32>
    %cst_126 = arith.constant dense<0.000000e+00> : vector<2x8xf32>
    %303 = vector.multi_reduction <add>, %302, %cst_126 [2] : vector<2x8x8xf32> to vector<2x8xf32>
    %304 = vector.shape_cast %303 : vector<2x8xf32> to vector<2x8x1xf32>
    %305 = tpu.reciprocal %304 {approx = true} : vector<2x8x1xf32> -> vector<2x8x1xf32>
    %306 = vector.broadcast %305 : vector<2x8x1xf32> to vector<2x8x8xf32>
    %307 = arith.mulf %302, %306 : vector<2x8x8xf32>
    %308 = arith.truncf %307 : vector<2x8x8xf32> to vector<2x8x8xbf16>
    "tpu.trace_start"() <{level = 10 : i32, message = "bts,bsd->btd"}> : () -> ()
    %cst_127 = arith.constant dense<0.000000e+00> : vector<2x8x8xf32>
    %309 = tpu.matmul %308, %294, %cst_127 {dimension_numbers = #tpu.dot_dimension_numbers<[2], [1], [1], [2], [0, 0, 0, 1, 1, 2], [0], [0]>} : vector<2x8x8xbf16>, vector<2x8x8xbf16>, vector<2x8x8xf32> -> vector<2x8x8xf32>
    "tpu.trace_stop"() : () -> ()
    %310 = vector.shape_cast %309 : vector<2x8x8xf32> to vector<16x8xf32>
    %311 = arith.truncf %310 : vector<16x8xf32> to vector<16x8xbf16>
    %c1_128 = arith.constant 1 : index
    %c8_129 = arith.constant 8 : index
    %c0_130 = arith.constant 0 : index
    %312 = vector.load %arg4[%c1_128, %c8_129, %c0_130] : memref<2x32x32xbf16, #tpu.memory_space<vmem>>, vector<1x8x32xbf16>
    %313 = vector.shape_cast %312 : vector<1x8x32xbf16> to vector<8x32xbf16>
    %cst_131 = arith.constant dense<0.000000e+00> : vector<16x32xf32>
    %314 = tpu.matmul %311, %313, %cst_131 {dimension_numbers = #tpu.dot_dimension_numbers<[1], [0], [0], [1], [0, 0, 1, 1], [], []>} : vector<16x8xbf16>, vector<8x32xbf16>, vector<16x32xf32> -> vector<16x32xf32>
    %315 = arith.addf %291, %314 : vector<16x32xf32>
    %316 = vector.extract_strided_slice %266 {offsets = [0, 0, 16], sizes = [2, 8, 8], strides = [1, 1, 1]} : vector<2x8x96xbf16> to vector<2x8x8xbf16>
    %317 = vector.extract_strided_slice %266 {offsets = [0, 0, 48], sizes = [2, 8, 8], strides = [1, 1, 1]} : vector<2x8x96xbf16> to vector<2x8x8xbf16>
    %318 = vector.extract_strided_slice %266 {offsets = [0, 0, 80], sizes = [2, 8, 8], strides = [1, 1, 1]} : vector<2x8x96xbf16> to vector<2x8x8xbf16>
    "tpu.trace_start"() <{level = 10 : i32, message = "btd,bsd->bts"}> : () -> ()
    %cst_132 = arith.constant dense<0.000000e+00> : vector<2x8x8xf32>
    %319 = tpu.matmul %316, %317, %cst_132 {dimension_numbers = #tpu.dot_dimension_numbers<[2], [2], [1], [1], [0, 0, 0, 1, 1, 1], [0], [0]>} : vector<2x8x8xbf16>, vector<2x8x8xbf16>, vector<2x8x8xf32> -> vector<2x8x8xf32>
    "tpu.trace_stop"() : () -> ()
    %cst_133 = arith.constant 0.353553385 : f32
    %320 = vector.broadcast %cst_133 : f32 to vector<2x8x8xf32>
    %321 = arith.mulf %319, %320 : vector<2x8x8xf32>
    %cst_134 = arith.constant dense<0xFF800000> : vector<2x8xf32>
    %322 = vector.multi_reduction <maximumf>, %321, %cst_134 [2] : vector<2x8x8xf32> to vector<2x8xf32>
    %323 = vector.shape_cast %322 : vector<2x8xf32> to vector<2x8x1xf32>
    %324 = vector.broadcast %323 : vector<2x8x1xf32> to vector<2x8x8xf32>
    %325 = arith.subf %321, %324 : vector<2x8x8xf32>
    %326 = math.exp %325 : vector<2x8x8xf32>
    %cst_135 = arith.constant dense<0.000000e+00> : vector<2x8xf32>
    %327 = vector.multi_reduction <add>, %326, %cst_135 [2] : vector<2x8x8xf32> to vector<2x8xf32>
    %328 = vector.shape_cast %327 : vector<2x8xf32> to vector<2x8x1xf32>
    %329 = tpu.reciprocal %328 {approx = true} : vector<2x8x1xf32> -> vector<2x8x1xf32>
    %330 = vector.broadcast %329 : vector<2x8x1xf32> to vector<2x8x8xf32>
    %331 = arith.mulf %326, %330 : vector<2x8x8xf32>
    %332 = arith.truncf %331 : vector<2x8x8xf32> to vector<2x8x8xbf16>
    "tpu.trace_start"() <{level = 10 : i32, message = "bts,bsd->btd"}> : () -> ()
    %cst_136 = arith.constant dense<0.000000e+00> : vector<2x8x8xf32>
    %333 = tpu.matmul %332, %318, %cst_136 {dimension_numbers = #tpu.dot_dimension_numbers<[2], [1], [1], [2], [0, 0, 0, 1, 1, 2], [0], [0]>} : vector<2x8x8xbf16>, vector<2x8x8xbf16>, vector<2x8x8xf32> -> vector<2x8x8xf32>
    "tpu.trace_stop"() : () -> ()
    %334 = vector.shape_cast %333 : vector<2x8x8xf32> to vector<16x8xf32>
    %335 = arith.truncf %334 : vector<16x8xf32> to vector<16x8xbf16>
    %c1_137 = arith.constant 1 : index
    %c16_138 = arith.constant 16 : index
    %c0_139 = arith.constant 0 : index
    %336 = vector.load %arg4[%c1_137, %c16_138, %c0_139] : memref<2x32x32xbf16, #tpu.memory_space<vmem>>, vector<1x8x32xbf16>
    %337 = vector.shape_cast %336 : vector<1x8x32xbf16> to vector<8x32xbf16>
    %cst_140 = arith.constant dense<0.000000e+00> : vector<16x32xf32>
    %338 = tpu.matmul %335, %337, %cst_140 {dimension_numbers = #tpu.dot_dimension_numbers<[1], [0], [0], [1], [0, 0, 1, 1], [], []>} : vector<16x8xbf16>, vector<8x32xbf16>, vector<16x32xf32> -> vector<16x32xf32>
    %339 = arith.addf %315, %338 : vector<16x32xf32>
    %340 = vector.extract_strided_slice %266 {offsets = [0, 0, 24], sizes = [2, 8, 8], strides = [1, 1, 1]} : vector<2x8x96xbf16> to vector<2x8x8xbf16>
    %341 = vector.extract_strided_slice %266 {offsets = [0, 0, 56], sizes = [2, 8, 8], strides = [1, 1, 1]} : vector<2x8x96xbf16> to vector<2x8x8xbf16>
    %342 = vector.extract_strided_slice %266 {offsets = [0, 0, 88], sizes = [2, 8, 8], strides = [1, 1, 1]} : vector<2x8x96xbf16> to vector<2x8x8xbf16>
    "tpu.trace_start"() <{level = 10 : i32, message = "btd,bsd->bts"}> : () -> ()
    %cst_141 = arith.constant dense<0.000000e+00> : vector<2x8x8xf32>
    %343 = tpu.matmul %340, %341, %cst_141 {dimension_numbers = #tpu.dot_dimension_numbers<[2], [2], [1], [1], [0, 0, 0, 1, 1, 1], [0], [0]>} : vector<2x8x8xbf16>, vector<2x8x8xbf16>, vector<2x8x8xf32> -> vector<2x8x8xf32>
    "tpu.trace_stop"() : () -> ()
    %cst_142 = arith.constant 0.353553385 : f32
    %344 = vector.broadcast %cst_142 : f32 to vector<2x8x8xf32>
    %345 = arith.mulf %343, %344 : vector<2x8x8xf32>
    %cst_143 = arith.constant dense<0xFF800000> : vector<2x8xf32>
    %346 = vector.multi_reduction <maximumf>, %345, %cst_143 [2] : vector<2x8x8xf32> to vector<2x8xf32>
    %347 = vector.shape_cast %346 : vector<2x8xf32> to vector<2x8x1xf32>
    %348 = vector.broadcast %347 : vector<2x8x1xf32> to vector<2x8x8xf32>
    %349 = arith.subf %345, %348 : vector<2x8x8xf32>
    %350 = math.exp %349 : vector<2x8x8xf32>
    %cst_144 = arith.constant dense<0.000000e+00> : vector<2x8xf32>
    %351 = vector.multi_reduction <add>, %350, %cst_144 [2] : vector<2x8x8xf32> to vector<2x8xf32>
    %352 = vector.shape_cast %351 : vector<2x8xf32> to vector<2x8x1xf32>
    %353 = tpu.reciprocal %352 {approx = true} : vector<2x8x1xf32> -> vector<2x8x1xf32>
    %354 = vector.broadcast %353 : vector<2x8x1xf32> to vector<2x8x8xf32>
    %355 = arith.mulf %350, %354 : vector<2x8x8xf32>
    %356 = arith.truncf %355 : vector<2x8x8xf32> to vector<2x8x8xbf16>
    "tpu.trace_start"() <{level = 10 : i32, message = "bts,bsd->btd"}> : () -> ()
    %cst_145 = arith.constant dense<0.000000e+00> : vector<2x8x8xf32>
    %357 = tpu.matmul %356, %342, %cst_145 {dimension_numbers = #tpu.dot_dimension_numbers<[2], [1], [1], [2], [0, 0, 0, 1, 1, 2], [0], [0]>} : vector<2x8x8xbf16>, vector<2x8x8xbf16>, vector<2x8x8xf32> -> vector<2x8x8xf32>
    "tpu.trace_stop"() : () -> ()
    %358 = vector.shape_cast %357 : vector<2x8x8xf32> to vector<16x8xf32>
    %359 = arith.truncf %358 : vector<16x8xf32> to vector<16x8xbf16>
    %c1_146 = arith.constant 1 : index
    %c24_147 = arith.constant 24 : index
    %c0_148 = arith.constant 0 : index
    %360 = vector.load %arg4[%c1_146, %c24_147, %c0_148] : memref<2x32x32xbf16, #tpu.memory_space<vmem>>, vector<1x8x32xbf16>
    %361 = vector.shape_cast %360 : vector<1x8x32xbf16> to vector<8x32xbf16>
    %cst_149 = arith.constant dense<0.000000e+00> : vector<16x32xf32>
    %362 = tpu.matmul %359, %361, %cst_149 {dimension_numbers = #tpu.dot_dimension_numbers<[1], [0], [0], [1], [0, 0, 1, 1], [], []>} : vector<16x8xbf16>, vector<8x32xbf16>, vector<16x32xf32> -> vector<16x32xf32>
    %363 = arith.addf %339, %362 : vector<16x32xf32>
    %364 = arith.addf %226, %363 : vector<16x32xf32>
    %c1_150 = arith.constant 1 : index
    %c0_151 = arith.constant 0 : index
    %c96_152 = arith.constant 96 : index
    %365 = vector.load %arg7[%c1_150, %c0_151, %c96_152] : memref<2x1x352xf32, #tpu.memory_space<vmem>>, vector<1x1x32xf32>
    %366 = vector.shape_cast %365 : vector<1x1x32xf32> to vector<1x32xf32>
    %367 = vector.broadcast %366 : vector<1x32xf32> to vector<16x32xf32>
    %368 = arith.addf %364, %367 : vector<16x32xf32>
    %c1_153 = arith.constant 1 : index
    %c0_154 = arith.constant 0 : index
    %c128_155 = arith.constant 128 : index
    %369 = vector.load %arg7[%c1_153, %c0_154, %c128_155] : memref<2x1x352xf32, #tpu.memory_space<vmem>>, vector<1x1x32xf32>
    %370 = vector.shape_cast %369 : vector<1x1x32xf32> to vector<1x32xf32>
    %c1_156 = arith.constant 1 : index
    %c0_157 = arith.constant 0 : index
    %c160_158 = arith.constant 160 : index
    %371 = vector.load %arg7[%c1_156, %c0_157, %c160_158] : memref<2x1x352xf32, #tpu.memory_space<vmem>>, vector<1x1x32xf32>
    %372 = vector.shape_cast %371 : vector<1x1x32xf32> to vector<1x32xf32>
    %cst_159 = arith.constant dense<0.000000e+00> : vector<16xf32>
    %373 = vector.multi_reduction <add>, %368, %cst_159 [1] : vector<16x32xf32> to vector<16xf32>
    %374 = vector.shape_cast %373 : vector<16xf32> to vector<16x1xf32>
    %cst_160 = arith.constant 3.200000e+01 : f32
    %375 = vector.broadcast %cst_160 : f32 to vector<16x1xf32>
    %376 = arith.divf %374, %375 : vector<16x1xf32>
    %377 = vector.broadcast %376 : vector<16x1xf32> to vector<16x32xf32>
    %378 = arith.subf %368, %377 : vector<16x32xf32>
    %379 = arith.mulf %378, %378 : vector<16x32xf32>
    %cst_161 = arith.constant dense<0.000000e+00> : vector<16xf32>
    %380 = vector.multi_reduction <add>, %379, %cst_161 [1] : vector<16x32xf32> to vector<16xf32>
    %381 = vector.shape_cast %380 : vector<16xf32> to vector<16x1xf32>
    %cst_162 = arith.constant 3.200000e+01 : f32
    %382 = vector.broadcast %cst_162 : f32 to vector<16x1xf32>
    %383 = arith.divf %381, %382 : vector<16x1xf32>
    %384 = vector.broadcast %376 : vector<16x1xf32> to vector<16x32xf32>
    %385 = arith.subf %368, %384 : vector<16x32xf32>
    %cst_163 = arith.constant 9.99999974E-6 : f32
    %386 = vector.broadcast %cst_163 : f32 to vector<16x1xf32>
    %387 = arith.addf %383, %386 : vector<16x1xf32>
    %388 = math.rsqrt %387 : vector<16x1xf32>
    %389 = vector.broadcast %388 : vector<16x1xf32> to vector<16x32xf32>
    %390 = arith.mulf %385, %389 : vector<16x32xf32>
    %391 = vector.broadcast %370 : vector<1x32xf32> to vector<16x32xf32>
    %392 = arith.mulf %390, %391 : vector<16x32xf32>
    %393 = vector.broadcast %372 : vector<1x32xf32> to vector<16x32xf32>
    %394 = arith.addf %392, %393 : vector<16x32xf32>
    %395 = arith.truncf %394 : vector<16x32xf32> to vector<16x32xbf16>
    %c1_164 = arith.constant 1 : index
    %c0_165 = arith.constant 0 : index
    %c0_166 = arith.constant 0 : index
    %396 = vector.load %arg5[%c1_164, %c0_165, %c0_166] : memref<2x32x128xbf16, #tpu.memory_space<vmem>>, vector<1x32x128xbf16>
    %397 = vector.shape_cast %396 : vector<1x32x128xbf16> to vector<32x128xbf16>
    %cst_167 = arith.constant dense<0.000000e+00> : vector<16x128xf32>
    %398 = tpu.matmul %395, %397, %cst_167 {dimension_numbers = #tpu.dot_dimension_numbers<[1], [0], [0], [1], [0, 0, 1, 1], [], []>} : vector<16x32xbf16>, vector<32x128xbf16>, vector<16x128xf32> -> vector<16x128xf32>
    %c1_168 = arith.constant 1 : index
    %c0_169 = arith.constant 0 : index
    %c192_170 = arith.constant 192 : index
    %399 = vector.load %arg7[%c1_168, %c0_169, %c192_170] : memref<2x1x352xf32, #tpu.memory_space<vmem>>, vector<1x1x128xf32>
    %400 = vector.shape_cast %399 : vector<1x1x128xf32> to vector<1x128xf32>
    %401 = vector.broadcast %400 : vector<1x128xf32> to vector<16x128xf32>
    %402 = arith.addf %398, %401 : vector<16x128xf32>
    %cst_171 = arith.constant 5.000000e-01 : f32
    %403 = vector.broadcast %cst_171 : f32 to vector<16x128xf32>
    %404 = arith.mulf %403, %402 : vector<16x128xf32>
    %cst_172 = arith.constant 0.707106769 : f32
    %405 = vector.broadcast %cst_172 : f32 to vector<16x128xf32>
    %406 = arith.mulf %402, %405 : vector<16x128xf32>
    %cst_173 = arith.constant 0.000000e+00 : f32
    %407 = vector.broadcast %cst_173 : f32 to vector<16x128xf32>
    %408 = arith.cmpf oge, %406, %407 : vector<16x128xf32>
    %cst_174 = arith.constant 1.000000e+00 : f32
    %cst_175 = arith.constant -1.000000e+00 : f32
    %409 = vector.broadcast %cst_174 : f32 to vector<16x128xf32>
    %410 = vector.broadcast %cst_175 : f32 to vector<16x128xf32>
    %411 = arith.select %408, %409, %410 : vector<16x128xi1>, vector<16x128xf32>
    %412 = math.absf %406 : vector<16x128xf32>
    %cst_176 = arith.constant 0.327591091 : f32
    %413 = vector.broadcast %cst_176 : f32 to vector<16x128xf32>
    %414 = arith.mulf %413, %412 : vector<16x128xf32>
    %cst_177 = arith.constant 1.000000e+00 : f32
    %415 = vector.broadcast %cst_177 : f32 to vector<16x128xf32>
    %416 = arith.addf %415, %414 : vector<16x128xf32>
    %417 = tpu.reciprocal %416 {approx = true} : vector<16x128xf32> -> vector<16x128xf32>
    %cst_178 = arith.constant 1.06140542 : f32
    %418 = vector.broadcast %cst_178 : f32 to vector<16x128xf32>
    %419 = arith.mulf %418, %417 : vector<16x128xf32>
    %cst_179 = arith.constant -1.45315206 : f32
    %420 = vector.broadcast %cst_179 : f32 to vector<16x128xf32>
    %421 = arith.addf %419, %420 : vector<16x128xf32>
    %422 = arith.mulf %421, %417 : vector<16x128xf32>
    %cst_180 = arith.constant 1.42141378 : f32
    %423 = vector.broadcast %cst_180 : f32 to vector<16x128xf32>
    %424 = arith.addf %422, %423 : vector<16x128xf32>
    %425 = arith.mulf %424, %417 : vector<16x128xf32>
    %cst_181 = arith.constant -0.284496725 : f32
    %426 = vector.broadcast %cst_181 : f32 to vector<16x128xf32>
    %427 = arith.addf %425, %426 : vector<16x128xf32>
    %428 = arith.mulf %427, %417 : vector<16x128xf32>
    %cst_182 = arith.constant 0.254829586 : f32
    %429 = vector.broadcast %cst_182 : f32 to vector<16x128xf32>
    %430 = arith.addf %428, %429 : vector<16x128xf32>
    %431 = arith.mulf %430, %417 : vector<16x128xf32>
    %cst_183 = arith.constant 0.000000e+00 : f32
    %432 = vector.broadcast %cst_183 : f32 to vector<16x128xf32>
    %433 = arith.subf %432, %412 : vector<16x128xf32>
    %434 = arith.mulf %433, %412 : vector<16x128xf32>
    %435 = math.exp %434 : vector<16x128xf32>
    %436 = arith.mulf %431, %435 : vector<16x128xf32>
    %cst_184 = arith.constant 1.000000e+00 : f32
    %437 = vector.broadcast %cst_184 : f32 to vector<16x128xf32>
    %438 = arith.subf %437, %436 : vector<16x128xf32>
    %439 = arith.mulf %411, %438 : vector<16x128xf32>
    %cst_185 = arith.constant 1.000000e+00 : f32
    %440 = vector.broadcast %cst_185 : f32 to vector<16x128xf32>
    %441 = arith.addf %440, %439 : vector<16x128xf32>
    %442 = arith.mulf %404, %441 : vector<16x128xf32>
    %443 = arith.truncf %442 : vector<16x128xf32> to vector<16x128xbf16>
    %c1_186 = arith.constant 1 : index
    %c0_187 = arith.constant 0 : index
    %c0_188 = arith.constant 0 : index
    %444 = vector.load %arg6[%c1_186, %c0_187, %c0_188] : memref<2x128x32xbf16, #tpu.memory_space<vmem>>, vector<1x128x32xbf16>
    %445 = vector.shape_cast %444 : vector<1x128x32xbf16> to vector<128x32xbf16>
    %cst_189 = arith.constant dense<0.000000e+00> : vector<16x32xf32>
    %446 = tpu.matmul %443, %445, %cst_189 {dimension_numbers = #tpu.dot_dimension_numbers<[1], [0], [0], [1], [0, 0, 1, 1], [], []>} : vector<16x128xbf16>, vector<128x32xbf16>, vector<16x32xf32> -> vector<16x32xf32>
    %c1_190 = arith.constant 1 : index
    %c0_191 = arith.constant 0 : index
    %c320_192 = arith.constant 320 : index
    %447 = vector.load %arg7[%c1_190, %c0_191, %c320_192] : memref<2x1x352xf32, #tpu.memory_space<vmem>>, vector<1x1x32xf32>
    %448 = vector.shape_cast %447 : vector<1x1x32xf32> to vector<1x32xf32>
    %449 = vector.broadcast %448 : vector<1x32xf32> to vector<16x32xf32>
    %450 = arith.addf %446, %449 : vector<16x32xf32>
    %451 = arith.addf %368, %450 : vector<16x32xf32>
    %452 = vector.shape_cast %451 : vector<16x32xf32> to vector<2x8x32xf32>
    %c0_193 = arith.constant 0 : index
    %c0_194 = arith.constant 0 : index
    %c0_195 = arith.constant 0 : index
    %453 = vector.load %arg8[%c0_193, %c0_194, %c0_195] : memref<2x8x32xf32, #tpu.memory_space<vmem>>, vector<2x8x32xf32>
    tpu.vector_store %arg8[%c0_193, %c0_194, %c0_195], %452 {strides = array<i32>} : memref<2x8x32xf32, #tpu.memory_space<vmem>>, vector<2x8x32xf32>,
    return
  }
  func.func @transform_0(%arg0: i32) -> (i32, i32, i32, i32) {
    %c0_i32 = arith.constant 0 : i32
    %c0_i32_0 = arith.constant 0 : i32
    %c0_i32_1 = arith.constant 0 : i32
    %c0_i32_2 = arith.constant 0 : i32
    return %c0_i32, %arg0, %c0_i32_0, %c0_i32_1 : i32, i32, i32, i32
  }
  func.func @transform_1(%arg0: i32) -> (i32, i32, i32) {
    %c0_i32 = arith.constant 0 : i32
    %c0_i32_0 = arith.constant 0 : i32
    %c0_i32_1 = arith.constant 0 : i32
    return %arg0, %c0_i32, %c0_i32_0 : i32, i32, i32
  }
  func.func @transform_2(%arg0: i32) -> (i32, i32, i32) {
    %c0_i32 = arith.constant 0 : i32
    %c0_i32_0 = arith.constant 0 : i32
    %c0_i32_1 = arith.constant 0 : i32
    %c0_i32_2 = arith.constant 0 : i32
    return %c0_i32, %c0_i32_0, %c0_i32_1 : i32, i32, i32
  }
  func.func @transform_3(%arg0: i32) -> (i32, i32, i32) {
    %c0_i32 = arith.constant 0 : i32
    %c0_i32_0 = arith.constant 0 : i32
    %c0_i32_1 = arith.constant 0 : i32
    %c0_i32_2 = arith.constant 0 : i32
    return %c0_i32, %c0_i32_0, %c0_i32_1 : i32, i32, i32
  }
  func.func @transform_4(%arg0: i32) -> (i32, i32, i32) {
    %c0_i32 = arith.constant 0 : i32
    %c0_i32_0 = arith.constant 0 : i32
    %c0_i32_1 = arith.constant 0 : i32
    %c0_i32_2 = arith.constant 0 : i32
    return %c0_i32, %c0_i32_0, %c0_i32_1 : i32, i32, i32
  }
  func.func @transform_5(%arg0: i32) -> (i32, i32, i32) {
    %c0_i32 = arith.constant 0 : i32
    %c0_i32_0 = arith.constant 0 : i32
    %c0_i32_1 = arith.constant 0 : i32
    %c0_i32_2 = arith.constant 0 : i32
    return %c0_i32, %c0_i32_0, %c0_i32_1 : i32, i32, i32
  }
  func.func @transform_6(%arg0: i32) -> (i32, i32, i32) {
    %c0_i32 = arith.constant 0 : i32
    %c0_i32_0 = arith.constant 0 : i32
    %c0_i32_1 = arith.constant 0 : i32
    %c0_i32_2 = arith.constant 0 : i32
    return %c0_i32, %c0_i32_0, %c0_i32_1 : i32, i32, i32
  }
  func.func @transform_7(%arg0: i32) -> (i32, i32, i32) {
    %c0_i32 = arith.constant 0 : i32
    %c0_i32_0 = arith.constant 0 : i32
    %c0_i32_1 = arith.constant 0 : i32
    return %arg0, %c0_i32, %c0_i32_0 : i32, i32, i32
  }
}

</mosaic_0001>

<bundles_post_ra>
// kernel: encoder_forward.1
= control target key start
LH: loop header
LB: loop body
LE: loop exit
PB: predicated region body
PF: predicated region fallthrough
CT: control target
= control target key end

     0   :  { %vm32_vm0 = vcmask 261120   ;;  %s2779_s0 = inlined_call_operand.vmem [shape: f32[2,2,1,64], index: 0, kind: input, shape index: {}]   ;;  %s2780_s1 = inlined_call_operand.vmem [shape: f32[2,8,32], index: 1, kind: input, shape index: {}]   ;;  %s2781_s2 = inlined_call_operand.vmem [shape: bf16[2,32,96], index: 2, kind: input, shape index: {}]   ;;  %s2782_s3 = inlined_call_operand.vmem [shape: bf16[2,32,32], index: 3, kind: input, shape index: {}]   ;;  %s2783_s4 = inlined_call_operand.vmem [shape: bf16[2,32,128], index: 4, kind: input, shape index: {}]   ;;  %s2784_s5 = inlined_call_operand.vmem [shape: bf16[2,128,32], index: 5, kind: input, shape index: {}]   ;;  %s2785_s6 = inlined_call_operand.vmem [shape: f32[2,1,352], index: 6, kind: input, shape index: {}]   ;;  %s2786_s7 = inlined_call_operand.hbm [shape: f32[2,8,32], index: 7, kind: output, shape index: {}]  }
   0x1   :  { %v2291_v0 = vld [vmem:[%s2780_s1] sm:$0xff] }
   0x2   :  { %v33_v1 = vsel %vm32_vm0, %v2291_v0, 0.0 }
   0x3   :  { %34 = vadd.xlane.f32.xlu0 %v33_v1 }
   0x4   :  { %12 = vsyncpa [#allocation3], 0  ;;  %v2298_v2 = vld [vmem:[%s2780_s1 + $0x8] sm:$0xff]  ;;  %v2231_v4 = vmov 32.0   ;;  %v2095_v7 = vld [vmem:[%s2779_s0] ss:$0 sm:$0xff] }
   0x5   :  { %v36_v3 = vsel %vm32_vm0, %v2298_v2, 0.0  ;;  %2107 = vrcp.f32 %v2231_v4  ;;  %s2232_s30 = smov 96   ;;  %v2096_v10 = vld [vmem:[%s2779_s0 + $0x1] ss:$0 sm:$0xff]  ;;  %v2055_v23 = vld [vmem:[%s2781_s2 + $0x8] sm:$0xff]  ;;  %s2233_s19 = smov 120  }
   0x6   :  { %98 = vrot.lane.b32.xlu2 %v2095_v7, %s2232_s30  ;;  %136 = vmatpush.bf16.msra.mxu0 %v2055_v23  ;;  %v2054_v26 = vld [vmem:[%s2781_s2] sm:$0xff]  ;;  %s2234_s20 = smov 88   ;;  %s2235_s21 = smov 56   ;;  %vm151_vm8 = vcmask 64512   ;;  %vm226_vm9 = vcmask 1043456  }
   0x7   :  { %v30_v37 = vld [vmem:[%s2779_s0] sm:$0x1]  ;;  %v31_v40 = vld [vmem:[%s2779_s0 + $0x1] sm:$0x1]  ;;  %s2236_s22 = smov 80   ;;  %s2237_s23 = smov 48  }
   0x8   :  { %v84_v43 = vadd.f32 1.0, %v30_v37  ;;  %v85_v46 = vadd.f32 1.0, %v31_v40  ;;  %v2097_v60 = vld [vmem:[%s2785_s6] ss:$0 sm:$0xff]  ;;  %s2238_s24 = smov 72   ;;  %s2239_s25 = smov 112  }
   0x9   :  { %s2240_s26 = smov 104   ;;  %s2241_s27 = smov 64  }
   0xa   :  { %137 = vmatpush.bf16.msra.mxu0 %v2054_v26  ;;  %v88_v48 = vperm.slane %v84_v43, 0  ;;  %v89_v51 = vperm.slane %v85_v46, 0  ;;  %s2242_s9 = smov 40   ;;  %s2243_s16 = smov 32  }
   0xb   :  { %37 = vadd.xlane.f32.xlu0 %v36_v3  ;;  %v2108_v5 = vpop.eup %2107  ;;  %s2247_s29 = smov 8  }
   0xc   :  { %v40_v6 = vmul.f32 32.0, %v2108_v5  ;;  %vm44_vm1 = vweird.f32 %v2108_v5 }
   0xe   :  { %v41_v8 = vsub.f32 1.0, %v40_v6  ;;  %100 = vrot.lane.b32.xlu2 %v2096_v10, %s2232_s30 }
  0x10   :  { %v42_v9 = vmul.f32 %v2108_v5, %v41_v8 }
  0x12   :  { %v43_v11 = vadd.f32 %v2108_v5, %v42_v9 }
  0x14   :  { %v2310_v12 = vsel %vm44_vm1, %v2108_v5, %v43_v11  ;;  %vm788_vm1 = vcmask 523264  }
  0x60   :  { %v99_v42 = vpop.permute.xlu2 %98 }
  0x68   :  { %v101_v55 = vpop.permute.xlu2 %100 }
  0x76   :  { %v35_v13 = vpop.xlane.xlu0 %34 }
  0x77   :  { %v46_v14 = vmul.f32 %v2310_v12, %v35_v13 }
  0x79   :  { %v48_v15 = vsub.f32 %v2291_v0, %v46_v14 }
  0x7b   :  { %v50_v16 = vmul.f32 %v48_v15, %v48_v15 }
  0x7d   :  { %v52_v17 = vsel %vm32_vm0, %v50_v16, 0.0 }
  0x7e   :  { %53 = vadd.xlane.f32.xlu1 %v52_v17  ;;  %v38_v18 = vpop.xlane.xlu0 %37 }
  0x7f   :  { %v47_v19 = vmul.f32 %v2310_v12, %v38_v18 }
  0x81   :  { %v49_v20 = vsub.f32 %v2298_v2, %v47_v19 }
  0x83   :  { %v51_v21 = vmul.f32 %v49_v20, %v49_v20 }
  0x85   :  { %v55_v22 = vsel %vm32_vm0, %v51_v21, 0.0 }
  0x86   :  { %56 = vadd.xlane.f32.xlu1 %v55_v22 }
  0xf1   :  { %v54_v24 = vpop.xlane.xlu1 %53 }
  0xf2   :  { %v58_v25 = vmul.f32 %v54_v24, %v2310_v12 }
  0xf4   :  { %v60_v27 = vadd.f32 1e-05, %v58_v25 }
  0xf6   :  { %2109 = vrsqrt.f32 %v60_v27  ;;  %vm68_vm3 = vweird.f32 %v60_v27 }
  0xf9   :  { %v57_v28 = vpop.xlane.xlu1 %56 }
  0xfa   :  { %v59_v29 = vmul.f32 %v57_v28, %v2310_v12 }
  0xfc   :  { %v2110_v30 = vpop.eup %2109  ;;  %v61_v31 = vadd.f32 1e-05, %v59_v29 }
  0xfd   :  { %v63_v32 = vmul.f32 %v2110_v30, %v60_v27  ;;  %vm69_vm2 = vweird.f32 %v2110_v30 }
  0xfe   :  { %2111 = vrsqrt.f32 %v61_v31  ;;  %vm70_vm4 = vmor %vm68_vm3, %vm69_vm2  ;;  %vm78_vm6 = vweird.f32 %v61_v31 }
  0xff   :  { %v64_v33 = vmul.f32 %v2110_v30, %v63_v32 }
 0x101   :  { %v65_v34 = vmul.f32 0.5, %v64_v33 }
 0x103   :  { %v66_v35 = vsub.f32 1.5, %v65_v34 }
 0x104   :  { %v2112_v36 = vpop.eup %2111 }
 0x105   :  { %v73_v38 = vmul.f32 %v2112_v36, %v61_v31  ;;  %v67_v39 = vmul.f32 %v2110_v30, %v66_v35  ;;  %vm79_vm5 = vweird.f32 %v2112_v36 }
 0x106   :  { %vm80_vm7 = vmor %vm78_vm6, %vm79_vm5 }
 0x107   :  { %v74_v41 = vmul.f32 %v2112_v36, %v73_v38  ;;  %v71_v45 = vsel %vm70_vm4, %v2110_v30, %v67_v39 }
 0x108   :  { %v82_v49 = vmul.f32 %v71_v45, %v48_v15 }
 0x109   :  { %v75_v44 = vmul.f32 0.5, %v74_v41 }
 0x10a   :  { %v92_v53 = vmul.f32 %v88_v48, %v82_v49 }
 0x10b   :  { %v76_v47 = vsub.f32 1.5, %v75_v44 }
 0x10c   :  { %v104_v57 = vadd.f32 %v99_v42, %v92_v53 }
 0x10d   :  { %v77_v50 = vmul.f32 %v2112_v36, %v76_v47 }
 0x10f   :  { %v81_v52 = vsel %vm80_vm7, %v2112_v36, %v77_v50 }
 0x110   :  { %v83_v54 = vmul.f32 %v81_v52, %v49_v20 }
 0x112   :  { %v93_v56 = vmul.f32 %v89_v51, %v83_v54 }
 0x114   :  { %v105_v58 = vadd.f32 %v101_v55, %v93_v56 }
 0x116   :  { %v106_v59 = vpack.c.bf16 %v105_v58, %v104_v57 }
 0x118   :  { %1887 = vmatmul.msk.bf16.vlgmr.msra.gmra.mxu0 %vm32_vm0, %v106_v59 }
 0x195   :  { %v139_v61 = vpop.f32.mrf.mxu0 }
 0x196   :  { %v140_v62 = vadd.f32 %v2097_v60, %v139_v61 }
 0x198   :  { %v144_v63 = vpack.c.bf16 %v140_v62, %v140_v62 }
 0x19a   :  { %v147_v1 = vunpack.c.l.b16 %v144_v63 }
 0x19c   :  { %v2336_v3 = vpack.c.b16 %v147_v1, %v147_v1 }
 0x19d   :  { %v141_v4 = vpop.f32.mrf.mxu0 }
 0x19e   :  { %v142_v5 = vadd.f32 %v2097_v60, %v141_v4  ;;  %149 = vrot.lane.b32.xlu2 %v2336_v3, %s2232_s30  ;;  %266 = vrot.lane.b32.xlu1 %v2336_v3, %s2233_s19  ;;  %v381_v60 = vld [vmem:[%s2782_s3 + $0x4] sm:$0xf] }
 0x19f   :  { %268 = vrot.lane.b32.xlu0 %v2336_v3, %s2234_s20  ;;  %v386_v61 = vsel %vm226_vm9, %v381_v60, 0 }
 0x1a0   :  { %v145_v6 = vpack.c.bf16 %v142_v5, %v142_v5 }
 0x1a2   :  { %v172_v7 = vunpack.c.l.b16 %v145_v6 }
 0x1a4   :  { %v2344_v8 = vpack.c.b16 %v172_v7, %v172_v7 }
 0x1a6   :  { %174 = vrot.lane.b32.xlu2 %v2344_v8, %s2232_s30 }
 0x1a7   :  { %289 = vrot.lane.b32.xlu0 %v2344_v8, %s2233_s19 }
 0x1ae   :  { %291 = vrot.lane.b32.xlu2 %v2344_v8, %s2234_s20 }
 0x1af   :  { %338 = vrot.lane.b32.xlu0 %v2336_v3, %s2235_s21 }
 0x1f8   :  { %v150_v9 = vpop.permute.xlu2 %149 }
 0x1f9   :  { %v156_v10 = vsel %vm151_vm8, %v150_v9, 0 }
 0x1fa   :  { %165 = vmatpush.bf16.xpose.msra.mxu2 %v156_v10 }
 0x200   :  { %v175_v11 = vpop.permute.xlu2 %174 }
 0x201   :  { %1888 = vmatmul.msk.bf16.vlgmr.msra.gmra.mxu2 %vm151_vm8, %v144_v63  ;;  %v180_v13 = vsel %vm151_vm8, %v175_v11, 0 }
 0x202   :  { %189 = vmatpush.bf16.xpose.msrb.mxu2 %v180_v13 }
 0x208   :  { %v292_v14 = vpop.permute.xlu2 %291 }
 0x209   :  { %v297_v15 = vsel %vm151_vm8, %v292_v14, 0 }
 0x20a   :  { %306 = vmatpush.bf16.xpose.msra.mxu1 %v297_v15 }
 0x210   :  { %v267_v18 = vpop.permute.xlu1 %266 }
 0x211   :  { %v269_v16 = vpop.permute.xlu0 %268  ;;  %1889 = vmatmul.msk.bf16.vlgmr.msrb.gmra.mxu2 %vm151_vm8, %v145_v6 }
 0x212   :  { %v274_v17 = vsel %vm151_vm8, %v269_v16, 0 }
 0x213   :  { %283 = vmatpush.bf16.xpose.msrb.mxu0 %v274_v17 }
 0x219   :  { %v290_v19 = vpop.permute.xlu0 %289 }
 0x21a   :  { %1892 = vmatmul.msk.bf16.vlgmr.msrb.gmra.mxu0 %vm151_vm8, %v267_v18  ;;  %1893 = vmatmul.msk.bf16.vlgmr.msra.gmra.mxu1 %vm151_vm8, %v290_v19 }
 0x21b   :  { %395 = vmatpush.bf16.msra.mxu0 %v386_v61 }
 0x221   :  { %v339_v20 = vpop.permute.xlu0 %338 }
 0x222   :  { %v344_v21 = vsel %vm226_vm9, %v339_v20, 0 }
 0x223   :  { %353 = vmatpush.bf16.msra.mxu2 %v344_v21 }
 0x284   :  { %v167_v22 = vpop.f32.mrf.mxu2 }
 0x285   :  { %v195_v23 = vmul.f32 0.35355338, %v167_v22 }
 0x287   :  { %v197_v24 = vsel %vm151_vm8, %v195_v23, -inf }
 0x288   :  { %198 = vmax.xlane.f32.xlu0 %v197_v24 }
 0x28c   :  { %v169_v25 = vpop.f32.mrf.mxu2 }
 0x294   :  { %v191_v26 = vpop.f32.mrf.mxu2 }
 0x295   :  { %v196_v27 = vmul.f32 0.35355338, %v191_v26 }
 0x297   :  { %v285_v28 = vpop.f32.mrf.mxu0  ;;  %v308_v29 = vpop.f32.mrf.mxu1  ;;  %v200_v30 = vsel %vm151_vm8, %v196_v27, -inf }
 0x298   :  { %v312_v31 = vmul.f32 0.35355338, %v285_v28  ;;  %201 = vmax.xlane.f32.xlu0 %v200_v30  ;;  %v313_v33 = vmul.f32 0.35355338, %v308_v29 }
 0x29a   :  { %v314_v32 = vsel %vm151_vm8, %v312_v31, -inf  ;;  %v317_v37 = vsel %vm151_vm8, %v313_v33, -inf }
 0x29b   :  { %315 = vmax.xlane.f32.xlu2 %v314_v32 }
 0x29c   :  { %v193_v34 = vpop.f32.mrf.mxu2 }
 0x29f   :  { %v287_v35 = vpop.f32.mrf.mxu0  ;;  %v310_v36 = vpop.f32.mrf.mxu1 }
 0x2a0   :  { %318 = vmax.xlane.f32.xlu0 %v317_v37  ;;  %v265_v35 = vld [vmem:[%s2782_s3] sm:$0xf] }
 0x2a1   :  { %v406_v36 = vsel %vm226_vm9, %v265_v35, 0 }
 0x2a2   :  { %415 = vmatpush.bf16.msrb.mxu1 %v406_v36 }
 0x2b3   :  { %424 = vrot.lane.b32.xlu2 %v2336_v3, %s2236_s22 }
 0x2fb   :  { %v199_v38 = vpop.xlane.xlu0 %198 }
 0x2fc   :  { %v203_v39 = vsub.f32 %v195_v23, %v199_v38 }
 0x2fe   :  { %v205_v40 = vmul.f32 1.442695, %v203_v39 }
 0x300   :  { %2113 = vpow2.f32 %v205_v40 }
 0x306   :  { %v2114_v41 = vpop.eup %2113 }
 0x307   :  { %v209_v42 = vsel %vm151_vm8, %v2114_v41, 0.0 }
 0x308   :  { %210 = vadd.xlane.f32.xlu2 %v209_v42 }
 0x30b   :  { %v202_v43 = vpop.xlane.xlu0 %201 }
 0x30c   :  { %v204_v49 = vsub.f32 %v196_v27, %v202_v43 }
 0x30e   :  { %v316_v44 = vpop.xlane.xlu2 %315  ;;  %v207_v54 = vmul.f32 1.442695, %v204_v49 }
 0x30f   :  { %v320_v45 = vsub.f32 %v312_v31, %v316_v44 }
 0x311   :  { %v322_v46 = vmul.f32 1.442695, %v320_v45 }
 0x313   :  { %2115 = vpow2.f32 %v322_v46  ;;  %v319_v47 = vpop.xlane.xlu0 %318 }
 0x314   :  { %v321_v48 = vsub.f32 %v313_v33, %v319_v47 }
 0x316   :  { %v324_v50 = vmul.f32 1.442695, %v321_v48  ;;  %v425_v51 = vpop.permute.xlu2 %424 }
 0x317   :  { %v430_v52 = vsel %vm151_vm8, %v425_v51, 0 }
 0x318   :  { %2117 = vpow2.f32 %v324_v50  ;;  %439 = vmatpush.bf16.xpose.msrb.mxu2 %v430_v52 }
 0x319   :  { %v2116_v53 = vpop.eup %2115  ;;  %2119 = vpow2.f32 %v207_v54 }
 0x31a   :  { %v326_v55 = vsel %vm151_vm8, %v2116_v53, 0.0 }
 0x31b   :  { %327 = vadd.xlane.f32.xlu1 %v326_v55 }
 0x31e   :  { %v2372_v56 = vpop.eup %2117 }
 0x31f   :  { %v329_v57 = vsel %vm151_vm8, %v2372_v56, 0.0  ;;  %v2120_v58 = vpop.eup %2119 }
 0x320   :  { %494 = vrot.lane.b32.xlu2 %v2336_v3, %s2237_s23  ;;  %330 = vadd.xlane.f32.xlu0 %v329_v57  ;;  %v212_v59 = vsel %vm151_vm8, %v2120_v58, 0.0 }
 0x328   :  { %562 = vrot.lane.b32.xlu2 %v2336_v3, %s2238_s24  ;;  %213 = vadd.xlane.f32.xlu0 %v212_v59 }
 0x330   :  { %585 = vrot.lane.b32.xlu2 %v2344_v8, %s2238_s24 }
 0x334   :  { %422 = vrot.lane.b32.xlu1 %v2336_v3, %s2239_s25 }
 0x338   :  { %583 = vrot.lane.b32.xlu2 %v2344_v8, %s2240_s26 }
 0x33c   :  { %221 = vrot.lane.b32.xlu1 %v2336_v3, %s2241_s27  ;;  %447 = vrot.lane.b32.xlu0 %v2344_v8, %s2236_s22 }
 0x344   :  { %243 = vrot.lane.b32.xlu1 %v2344_v8, %s2241_s27 }
 0x34c   :  { %359 = vrot.lane.b32.xlu1 %v2344_v8, %s2235_s21 }
 0x354   :  { %445 = vrot.lane.b32.xlu1 %v2344_v8, %s2239_s25 }
 0x37b   :  { %v211_v62 = vpop.xlane.xlu2 %210 }
 0x383   :  { %v495_v63 = vpop.permute.xlu2 %494 }
 0x384   :  { %v500_v1 = vsel %vm226_vm9, %v495_v63, 0 }
 0x385   :  { %509 = vmatpush.bf16.msrb.mxu0 %v500_v1 }
 0x38b   :  { %v563_v29 = vpop.permute.xlu2 %562 }
 0x38c   :  { %v568_v31 = vsel %vm151_vm8, %v563_v29, 0 }
 0x38e   :  { %v328_v4 = vpop.xlane.xlu1 %327 }
 0x38f   :  { %2121 = vrcp.f32 %v328_v4 }
 0x390   :  { %2123 = vrcp.f32 %v211_v62 }
 0x393   :  { %v331_v10 = vpop.xlane.xlu0 %330  ;;  %v586_v46 = vpop.permute.xlu2 %585 }
 0x394   :  { %v591_v49 = vsel %vm151_vm8, %v586_v46, 0 }
 0x395   :  { %v2122_v5 = vpop.eup %2121 }
 0x396   :  { %v334_v6 = vmul.f32 %v2122_v5, %v2116_v53  ;;  %v2124_v11 = vpop.eup %2123 }
 0x397   :  { %v217_v13 = vmul.f32 %v2124_v11, %v2114_v41 }
 0x398   :  { %v336_v7 = vpack.c.bf16 %v334_v6, %v334_v6 }
 0x399   :  { %v219_v17 = vpack.c.bf16 %v217_v13, %v217_v13 }
 0x39a   :  { %1894 = vmatmul.msk.bf16.vlgmr.msra.gmra.mxu2 %vm151_vm8, %v336_v7 }
 0x39b   :  { %v214_v16 = vpop.xlane.xlu0 %213 }
 0x39c   :  { %2125 = vrcp.f32 %v214_v16 }
 0x39d   :  { %2127 = vrcp.f32 %v331_v10 }
 0x3a2   :  { %v2126_v20 = vpop.eup %2125 }
 0x3a3   :  { %v218_v21 = vmul.f32 %v2126_v20, %v2120_v58  ;;  %v2128_v27 = vpop.eup %2127 }
 0x3a4   :  { %v335_v28 = vmul.f32 %v2128_v27, %v2372_v56 }
 0x3a5   :  { %v220_v25 = vpack.c.bf16 %v218_v21, %v218_v21 }
 0x3a6   :  { %v423_v9 = vpop.permute.xlu1 %422  ;;  %v337_v30 = vpack.c.bf16 %v335_v28, %v335_v28 }
 0x3aa   :  { %1898 = vmatmul.msk.bf16.vlgmr.msrb.gmra.mxu2 %vm151_vm8, %v423_v9 }
 0x3ae   :  { %v222_v14 = vpop.permute.xlu1 %221  ;;  %v448_v24 = vpop.permute.xlu0 %447 }
 0x3af   :  { %v228_v15 = vsel %vm226_vm9, %v222_v14, 0  ;;  %v453_v26 = vsel %vm151_vm8, %v448_v24, 0  ;;  %v584_v14 = vpop.permute.xlu2 %583 }
 0x3b0   :  { %237 = vmatpush.bf16.msra.mxu3 %v228_v15 }
 0x3b3   :  { %1890 = vmatmul.msk.bf16.vlgmr.msra.gmra.mxu3 %vm151_vm8, %v219_v17 }
 0x3b6   :  { %v244_v18 = vpop.permute.xlu1 %243 }
 0x3b7   :  { %v249_v19 = vsel %vm226_vm9, %v244_v18, 0 }
 0x3b8   :  { %258 = vmatpush.bf16.msrb.mxu3 %v249_v19 }
 0x3be   :  { %v360_v22 = vpop.permute.xlu1 %359 }
 0x3bf   :  { %v365_v23 = vsel %vm226_vm9, %v360_v22, 0 }
 0x3c0   :  { %374 = vmatpush.bf16.msra.mxu3 %v365_v23 }
 0x3c3   :  { %1891 = vmatmul.msk.bf16.vlgmr.msrb.gmra.mxu3 %vm151_vm8, %v220_v25 }
 0x3c4   :  { %462 = vmatpush.bf16.xpose.msrb.mxu3 %v453_v26 }
 0x3c6   :  { %v446_v32 = vpop.permute.xlu1 %445 }
 0x3d3   :  { %1895 = vmatmul.msk.bf16.vlgmr.msra.gmra.mxu3 %vm151_vm8, %v337_v30 }
 0x3d4   :  { %577 = vmatpush.bf16.xpose.msra.mxu3 %v568_v31 }
 0x3e3   :  { %1899 = vmatmul.msk.bf16.vlgmr.msrb.gmra.mxu3 %vm151_vm8, %v446_v32 }
 0x41d   :  { %v355_v33 = vpop.f32.mrf.mxu2 }
 0x425   :  { %v357_v34 = vpop.f32.mrf.mxu2 }
 0x42d   :  { %v441_v37 = vpop.f32.mrf.mxu2 }
 0x42e   :  { %v468_v38 = vmul.f32 0.35355338, %v441_v37  ;;  %v537_v37 = vld [vmem:[%s2782_s3 + $0x8] sm:$0xf] }
 0x430   :  { %v470_v39 = vsel %vm151_vm8, %v468_v38, -inf }
 0x431   :  { %471 = vmax.xlane.f32.xlu1 %v470_v39 }
 0x435   :  { %v443_v40 = vpop.f32.mrf.mxu2 }
 0x436   :  { %v239_v41 = vpop.f32.mrf.mxu3 }
 0x43e   :  { %v241_v42 = vpop.f32.mrf.mxu3 }
 0x446   :  { %v260_v43 = vpop.f32.mrf.mxu3 }
 0x447   :  { %v264_v44 = vpack.c.bf16 %v260_v43, %v239_v41 }
 0x449   :  { %1897 = vmatmul.msk.bf16.vlgmr.msrb.gmra.mxu1 %vm151_vm8, %v264_v44 }
 0x44a   :  { %560 = vrot.lane.b32.xlu1 %v2336_v3, %s2240_s26 }
 0x44e   :  { %v262_v45 = vpop.f32.mrf.mxu3 }
 0x456   :  { %v376_v47 = vpop.f32.mrf.mxu3 }
 0x457   :  { %v380_v48 = vpack.c.bf16 %v376_v47, %v355_v33 }
 0x459   :  { %1896 = vmatmul.msk.bf16.vlgmr.msra.gmra.mxu0 %vm151_vm8, %v380_v48 }
 0x45a   :  { %600 = vmatpush.bf16.xpose.msra.mxu0 %v591_v49 }
 0x45e   :  { %v378_v50 = vpop.f32.mrf.mxu3 }
 0x466   :  { %v464_v51 = vpop.f32.mrf.mxu3 }
 0x467   :  { %v469_v58 = vmul.f32 0.35355338, %v464_v51 }
 0x469   :  { %v473_v59 = vsel %vm151_vm8, %v469_v58, -inf }
 0x46e   :  { %v466_v52 = vpop.f32.mrf.mxu3 }
 0x4a4   :  { %v472_v53 = vpop.xlane.xlu1 %471 }
 0x4a5   :  { %v476_v54 = vsub.f32 %v468_v38, %v472_v53  ;;  %v542_v38 = vsel %vm226_vm9, %v537_v37, 0  ;;  %v768_v37 = vld [vmem:[%s2785_s6 + $0x1] sm:$0x3] }
 0x4a6   :  { %551 = vmatpush.bf16.msra.mxu2 %v542_v38 }
 0x4a7   :  { %v478_v55 = vmul.f32 1.442695, %v476_v54 }
 0x4a9   :  { %2129 = vpow2.f32 %v478_v55 }
 0x4af   :  { %v2130_v56 = vpop.eup %2129 }
 0x4b0   :  { %v482_v57 = vsel %vm151_vm8, %v2130_v56, 0.0 }
 0x4b1   :  { %483 = vadd.xlane.f32.xlu0 %v482_v57 }
 0x4b9   :  { %474 = vmax.xlane.f32.xlu0 %v473_v59 }
 0x4bc   :  { %v561_v60 = vpop.permute.xlu1 %560 }
 0x4bd   :  { %1903 = vmatmul.msk.bf16.vlgmr.msra.gmra.mxu3 %vm151_vm8, %v561_v60 }
 0x4c6   :  { %v417_v61 = vpop.f32.mrf.mxu1 }
 0x4cd   :  { %515 = vrot.lane.b32.xlu0 %v2344_v8, %s2237_s23 }
 0x4ce   :  { %v419_v39 = vpop.f32.mrf.mxu1 }
 0x4d6   :  { %v397_v62 = vpop.f32.mrf.mxu0 }
 0x4d7   :  { %v2429_v63 = vadd.f32 %v417_v61, %v397_v62  ;;  %v2098_v62 = vld [vmem:[%s2785_s6] ss:$0 sm:$0xff] }
 0x4de   :  { %v2436_v21 = vpop.f32.mrf.mxu0 }
 0x524   :  { %v484_v1 = vpop.xlane.xlu0 %483 }
 0x525   :  { %2131 = vrcp.f32 %v484_v1 }
 0x52b   :  { %v2132_v4 = vpop.eup %2131 }
 0x52c   :  { %v490_v5 = vmul.f32 %v2132_v4, %v2130_v56  ;;  %v475_v6 = vpop.xlane.xlu0 %474 }
 0x52d   :  { %v477_v7 = vsub.f32 %v469_v58, %v475_v6 }
 0x52e   :  { %v492_v9 = vpack.c.bf16 %v490_v5, %v490_v5 }
 0x52f   :  { %v480_v10 = vmul.f32 1.442695, %v477_v7 }
 0x530   :  { %1900 = vmatmul.msk.bf16.vlgmr.msrb.gmra.mxu0 %vm151_vm8, %v492_v9 }
 0x531   :  { %2133 = vpow2.f32 %v480_v10 }
 0x537   :  { %v2134_v11 = vpop.eup %2133 }
 0x538   :  { %v485_v13 = vsel %vm151_vm8, %v2134_v11, 0.0 }
 0x539   :  { %486 = vadd.xlane.f32.xlu2 %v485_v13 }
 0x53f   :  { %v516_v15 = vpop.permute.xlu0 %515 }
 0x540   :  { %v521_v16 = vsel %vm226_vm9, %v516_v15, 0  ;;  %v579_v17 = vpop.f32.mrf.mxu3  ;;  %1904 = vmatmul.msk.bf16.vlgmr.msra.gmra.mxu0 %vm151_vm8, %v584_v14  ;;  %v420_v14 = vadd.f32 %v419_v39, %v2436_v21  ;;  %v771_v39 = vperm.slane %v768_v37, 1 }
 0x541   :  { %v606_v18 = vmul.f32 0.35355338, %v579_v17  ;;  %530 = vmatpush.bf16.msra.mxu1 %v521_v16 }
 0x543   :  { %v608_v19 = vsel %vm151_vm8, %v606_v18, -inf }
 0x544   :  { %609 = vmax.xlane.f32.xlu0 %v608_v19 }
 0x548   :  { %v581_v20 = vpop.f32.mrf.mxu3 }
 0x558   :  { %703 = vrot.lane.b32.xlu0 %v2098_v62, %s2243_s16 }
 0x5ac   :  { %v487_v22 = vpop.xlane.xlu2 %486 }
 0x5ad   :  { %2135 = vrcp.f32 %v487_v22  ;;  %v511_v23 = vpop.f32.mrf.mxu0 }
 0x5b3   :  { %v2136_v24 = vpop.eup %2135 }
 0x5b4   :  { %v491_v25 = vmul.f32 %v2136_v24, %v2134_v11 }
 0x5b5   :  { %v513_v26 = vpop.f32.mrf.mxu0 }
 0x5b6   :  { %v493_v27 = vpack.c.bf16 %v491_v25, %v491_v25 }
 0x5b7   :  { %v610_v28 = vpop.xlane.xlu0 %609 }
 0x5b8   :  { %v614_v29 = vsub.f32 %v606_v18, %v610_v28  ;;  %1901 = vmatmul.msk.bf16.vlgmr.msra.gmra.mxu1 %vm151_vm8, %v493_v27 }
 0x5ba   :  { %v616_v30 = vmul.f32 1.442695, %v614_v29 }
 0x5bc   :  { %2137 = vpow2.f32 %v616_v30 }
 0x5bd   :  { %v602_v31 = vpop.f32.mrf.mxu0 }
 0x5be   :  { %v607_v32 = vmul.f32 0.35355338, %v602_v31 }
 0x5c0   :  { %v611_v33 = vsel %vm151_vm8, %v607_v32, -inf }
 0x5c1   :  { %612 = vmax.xlane.f32.xlu1 %v611_v33 }
 0x5c2   :  { %v2138_v34 = vpop.eup %2137 }
 0x5c3   :  { %v620_v35 = vsel %vm151_vm8, %v2138_v34, 0.0 }
 0x5c4   :  { %621 = vadd.xlane.f32.xlu2 %v620_v35 }
 0x5c5   :  { %v604_v36 = vpop.f32.mrf.mxu0 }
 0x5c6   :  { %v2056_v36 = vld [vmem:[%s2783_s4] sm:$0xff] }
 0x5ca   :  { %v704_v11 = vpop.permute.xlu0 %703 }
 0x5da   :  { %653 = vrot.lane.b32.xlu1 %v2344_v8, %s2242_s9 }
 0x634   :  { %v613_v40 = vpop.xlane.xlu1 %612 }
 0x635   :  { %v615_v41 = vsub.f32 %v607_v32, %v613_v40  ;;  %v532_v42 = vpop.f32.mrf.mxu1  ;;  %v2057_v32 = vld [vmem:[%s2783_s4 + $0x8] sm:$0xff]  ;;  %v770_v40 = vperm.slane %v768_v37, 0 }
 0x636   :  { %v536_v43 = vpack.c.bf16 %v532_v42, %v511_v23  ;;  %800 = vmatpush.bf16.msrb.mxu0 %v2057_v32 }
 0x637   :  { %v618_v44 = vmul.f32 1.442695, %v615_v41  ;;  %v622_v49 = vpop.xlane.xlu2 %621 }
 0x638   :  { %1902 = vmatmul.msk.bf16.vlgmr.msra.gmra.mxu2 %vm151_vm8, %v536_v43 }
 0x639   :  { %2139 = vpow2.f32 %v618_v44 }
 0x63a   :  { %2141 = vrcp.f32 %v622_v49  ;;  %801 = vmatpush.bf16.msrb.mxu0 %v2056_v36 }
 0x63d   :  { %v534_v45 = vpop.f32.mrf.mxu1 }
 0x63f   :  { %v2140_v46 = vpop.eup %2139 }
 0x640   :  { %v623_v8 = vsel %vm151_vm8, %v2140_v46, 0.0  ;;  %v2142_v51 = vpop.eup %2141 }
 0x641   :  { %624 = vadd.xlane.f32.xlu2 %v623_v8  ;;  %v628_v53 = vmul.f32 %v2142_v51, %v2138_v34 }
 0x643   :  { %v630_v60 = vpack.c.bf16 %v628_v53, %v628_v53 }
 0x64c   :  { %v654_v47 = vpop.permute.xlu1 %653 }
 0x64d   :  { %v659_v48 = vsel %vm226_vm9, %v654_v47, 0 }
 0x64e   :  { %668 = vmatpush.bf16.msrb.mxu2 %v659_v48 }
 0x659   :  { %632 = vrot.lane.b32.xlu2 %v2336_v3, %s2242_s9  ;;  %v675_v3 = vld [vmem:[%s2782_s3 + $0xc] sm:$0xf] }
 0x65a   :  { %v680_v61 = vsel %vm226_vm9, %v675_v3, 0 }
 0x65b   :  { %689 = vmatpush.bf16.msrb.mxu3 %v680_v61 }
 0x6b4   :  { %v625_v50 = vpop.xlane.xlu2 %624 }
 0x6b5   :  { %2143 = vrcp.f32 %v625_v50 }
 0x6bb   :  { %v2144_v52 = vpop.eup %2143  ;;  %v553_v54 = vpop.f32.mrf.mxu2 }
 0x6bc   :  { %v629_v55 = vmul.f32 %v2144_v52, %v2140_v46  ;;  %v558_v56 = vadd.f32 %v553_v54, %v2429_v63  ;;  %v633_v57 = vpop.permute.xlu2 %632 }
 0x6bd   :  { %v638_v58 = vsel %vm226_vm9, %v633_v57, 0 }
 0x6be   :  { %v631_v59 = vpack.c.bf16 %v629_v55, %v629_v55  ;;  %647 = vmatpush.bf16.msrb.mxu1 %v638_v58 }
 0x6c0   :  { %1906 = vmatmul.msk.bf16.vlgmr.msrb.gmra.mxu2 %vm151_vm8, %v631_v59 }
 0x6c1   :  { %1905 = vmatmul.msk.bf16.vlgmr.msrb.gmra.mxu1 %vm151_vm8, %v630_v60 }
 0x6c3   :  { %v555_v63 = vpop.f32.mrf.mxu2 }
 0x6c4   :  { %v559_v16 = vadd.f32 %v555_v63, %v420_v14  ;;  %v2065_v63 = vld [vmem:[%s2784_s5 + $0x38] sm:$0xff] }
 0x6c5   :  { %931 = vmatpush.bf16.msra.mxu1 %v2065_v63 }
 0x73e   :  { %v649_v1 = vpop.f32.mrf.mxu1 }
 0x743   :  { %v670_v4 = vpop.f32.mrf.mxu2 }
 0x744   :  { %v674_v5 = vpack.c.bf16 %v670_v4, %v649_v1 }
 0x746   :  { %v651_v6 = vpop.f32.mrf.mxu1  ;;  %1907 = vmatmul.msk.bf16.vlgmr.msrb.gmra.mxu3 %vm151_vm8, %v674_v5  ;;  %v2064_v5 = vld [vmem:[%s2784_s5 + $0x30] sm:$0xff] }
 0x747   :  { %932 = vmatpush.bf16.msra.mxu1 %v2064_v5 }
 0x74b   :  { %v672_v7 = vpop.f32.mrf.mxu2 }
 0x7c9   :  { %v691_v9 = vpop.f32.mrf.mxu3 }
 0x7ca   :  { %v696_v10 = vadd.f32 %v691_v9, %v558_v56  ;;  %v2063_v9 = vld [vmem:[%s2784_s5 + $0x28] sm:$0xff] }
 0x7cb   :  { %933 = vmatpush.bf16.msra.mxu1 %v2063_v9 }
 0x7cc   :  { %v698_v13 = vadd.f32 %v696_v10, %v2291_v0  ;;  %v2099_v0 = vld [vmem:[%s2785_s6 + $0x1] ss:$0 sm:$0xff] }
 0x7ce   :  { %v2467_v15 = vadd.f32 %v704_v11, %v698_v13  ;;  %v2062_v13 = vld [vmem:[%s2784_s5 + $0x20] sm:$0xff] }
 0x7cf   :  { %934 = vmatpush.bf16.msra.mxu1 %v2062_v13 }
 0x7d0   :  { %v709_v17 = vsel %vm32_vm0, %v2467_v15, 0.0 }
 0x7d1   :  { %v693_v18 = vpop.f32.mrf.mxu3  ;;  %710 = vadd.xlane.f32.xlu1 %v709_v17 }
 0x7d2   :  { %v697_v19 = vadd.f32 %v693_v18, %v559_v16  ;;  %v2061_v18 = vld [vmem:[%s2784_s5 + $0x18] sm:$0xff] }
 0x7d3   :  { %935 = vmatpush.bf16.msra.mxu1 %v2061_v18 }
 0x7d4   :  { %v699_v20 = vadd.f32 %v697_v19, %v2298_v2 }
 0x7d6   :  { %v2472_v22 = vadd.f32 %v704_v11, %v699_v20 }
 0x7d8   :  { %v712_v23 = vsel %vm32_vm0, %v2472_v22, 0.0 }
 0x7d9   :  { %713 = vadd.xlane.f32.xlu2 %v712_v23 }
 0x7f1   :  { %758 = vrot.lane.b32.xlu2 %v2099_v0, %s2232_s30 }
 0x844   :  { %v711_v21 = vpop.xlane.xlu1 %710 }
 0x845   :  { %v715_v24 = vmul.f32 %v711_v21, %v2310_v12 }
 0x847   :  { %v717_v25 = vsub.f32 %v2467_v15, %v715_v24 }
 0x849   :  { %v719_v26 = vmul.f32 %v717_v25, %v717_v25 }
 0x84b   :  { %v721_v2 = vsel %vm32_vm0, %v719_v26, 0.0 }
 0x84c   :  { %v714_v27 = vpop.xlane.xlu2 %713  ;;  %722 = vadd.xlane.f32.xlu0 %v721_v2 }
 0x84d   :  { %v716_v28 = vmul.f32 %v714_v27, %v2310_v12 }
 0x84f   :  { %v718_v29 = vsub.f32 %v2472_v22, %v716_v28 }
 0x851   :  { %v720_v30 = vmul.f32 %v718_v29, %v718_v29 }
 0x853   :  { %v724_v31 = vsel %vm32_vm0, %v720_v30, 0.0  ;;  %v2058_v30 = vld [vmem:[%s2784_s5] sm:$0xff] }
 0x854   :  { %725 = vadd.xlane.f32.xlu1 %v724_v31  ;;  %v759_v59 = vpop.permute.xlu2 %758 }
 0x860   :  { %784 = vrot.lane.b32.xlu0 %v770_v40, %s2241_s27 }
 0x86d   :  { %786 = vrot.lane.b32.xlu1 %v771_v39, %s2241_s27 }
 0x8bf   :  { %v723_v33 = vpop.xlane.xlu0 %722 }
 0x8c0   :  { %v727_v34 = vmul.f32 %v723_v33, %v2310_v12 }
 0x8c2   :  { %v729_v35 = vadd.f32 1e-05, %v727_v34  ;;  %v2100_v34 = vld [vmem:[%s2785_s6 + $0x2] ss:$0 sm:$0xff] }
 0x8c3   :  { %928 = vrot.lane.b32.xlu0 %v2100_v34, %s2241_s27  ;;  %v2066_v34 = vld [vmem:[%s2781_s2 + $0x10] sm:$0xff] }
 0x8c4   :  { %2145 = vrsqrt.f32 %v729_v35  ;;  %vm737_vm11 = vweird.f32 %v729_v35 }
 0x8c7   :  { %v726_v38 = vpop.xlane.xlu1 %725 }
 0x8c8   :  { %v728_v41 = vmul.f32 %v726_v38, %v2310_v12 }
 0x8ca   :  { %v2146_v42 = vpop.eup %2145  ;;  %v730_v43 = vadd.f32 1e-05, %v728_v41 }
 0x8cb   :  { %v732_v44 = vmul.f32 %v2146_v42, %v729_v35  ;;  %vm738_vm10 = vweird.f32 %v2146_v42 }
 0x8cc   :  { %2147 = vrsqrt.f32 %v730_v43  ;;  %vm739_vm12 = vmor %vm737_vm11, %vm738_vm10  ;;  %vm747_vm14 = vweird.f32 %v730_v43 }
 0x8cd   :  { %v733_v45 = vmul.f32 %v2146_v42, %v732_v44 }
 0x8cf   :  { %v734_v46 = vmul.f32 0.5, %v733_v45 }
 0x8d1   :  { %v735_v8 = vsub.f32 1.5, %v734_v46 }
 0x8d2   :  { %v2148_v47 = vpop.eup %2147  ;;  %v785_v1 = vpop.permute.xlu0 %784 }
 0x8d3   :  { %v736_v48 = vmul.f32 %v2146_v42, %v735_v8  ;;  %v742_v49 = vmul.f32 %v2148_v47, %v730_v43  ;;  %vm748_vm13 = vweird.f32 %v2148_v47 }
 0x8d4   :  { %vm749_vm15 = vmor %vm747_vm14, %vm748_vm13 }
 0x8d5   :  { %v743_v50 = vmul.f32 %v2148_v47, %v742_v49  ;;  %v740_v52 = vsel %vm739_vm12, %v2146_v42, %v736_v48 }
 0x8d6   :  { %v751_v54 = vmul.f32 %v740_v52, %v717_v25  ;;  %v2059_v25 = vld [vmem:[%s2784_s5 + $0x8] sm:$0xff] }
 0x8d7   :  { %v744_v51 = vmul.f32 0.5, %v743_v50 }
 0x8d8   :  { %v756_v58 = vmul.f32 %v2099_v0, %v751_v54 }
 0x8d9   :  { %v745_v53 = vsub.f32 1.5, %v744_v51 }
 0x8da   :  { %v761_v3 = vadd.f32 %v759_v59, %v756_v58 }
 0x8db   :  { %v746_v55 = vmul.f32 %v2148_v47, %v745_v53 }
 0x8dd   :  { %v750_v56 = vsel %vm749_vm15, %v2148_v47, %v746_v55 }
 0x8de   :  { %v752_v57 = vmul.f32 %v750_v56, %v718_v29 }
 0x8df   :  { %v787_v4 = vpop.permute.xlu1 %786 }
 0x8e0   :  { %v757_v60 = vmul.f32 %v2099_v0, %v752_v57  ;;  %v789_v6 = vsel %vm788_vm1, %v785_v1, %v787_v4  ;;  %v2060_v0 = vld [vmem:[%s2784_s5 + $0x10] sm:$0xff]  ;;  %v2244_v57 = vmov -1.0  }
 0x8e1   :  { %936 = vmatpush.bf16.msra.mxu1 %v2060_v0 }
 0x8e2   :  { %v762_v61 = vadd.f32 %v759_v59, %v757_v60 }
 0x8e4   :  { %v763_v62 = vpack.c.bf16 %v762_v61, %v761_v3 }
 0x8e5   :  { %937 = vmatpush.bf16.msra.mxu1 %v2059_v25 }
 0x8e6   :  { %1916 = vmatmul.msk.bf16.vlgmr.msrb.gmra.mxu0 %vm32_vm0, %v763_v62 }
 0x8e9   :  { %938 = vmatpush.bf16.msra.mxu1 %v2058_v30  ;;  %v2067_v30 = vld [vmem:[%s2781_s2 + $0x18] sm:$0xff] }
 0x8ea   :  { %1048 = vmatpush.bf16.msra.mxu2 %v2067_v30 }
 0x8ee   :  { %1049 = vmatpush.bf16.msra.mxu2 %v2066_v34 }
 0x963   :  { %v803_v7 = vpop.f32.mrf.mxu0 }
 0x964   :  { %v2510_v10 = vadd.f32 %v803_v7, %v789_v6 }
 0x966   :  { %v810_v11 = vmul.f32 0.70710677, %v2510_v10  ;;  %v808_v1 = vmul.f32 0.5, %v2510_v10 }
 0x968   :  { %v816_v14 = vand.u32 2147483647, %v810_v11  ;;  %vm812_vm2 = vcmp.ge.f32.partialorder %v810_v11, 0.0  ;;  %v929_v11 = vpop.permute.xlu0 %928 }
 0x969   :  { %v814_v58 = vsel %vm812_vm2, 1.0, %v2244_v57 }
 0x96a   :  { %v818_v16 = vmul.f32 0.3275911, %v816_v14  ;;  %v842_v2 = vsub.f32 0.0, %v816_v14 }
 0x96b   :  { %v805_v17 = vpop.f32.mrf.mxu0 }
 0x96c   :  { %v820_v19 = vadd.f32 1.0, %v818_v16  ;;  %v806_v20 = vadd.f32 %v805_v17, %v789_v6  ;;  %v844_v31 = vmul.f32 %v842_v2, %v816_v14 }
 0x96e   :  { %2149 = vrcp.f32 %v820_v19  ;;  %v811_v23 = vmul.f32 0.70710677, %v806_v20  ;;  %v846_v36 = vmul.f32 1.442695, %v844_v31  ;;  %v809_v4 = vmul.f32 0.5, %v806_v20 }
 0x970   :  { %v817_v21 = vand.u32 2147483647, %v811_v23  ;;  %vm813_vm3 = vcmp.ge.f32.partialorder %v811_v23, 0.0  ;;  %v2101_v23 = vld [vmem:[%s2779_s0 + $0x3] ss:$0 sm:$0xff] }
 0x971   :  { %v815_v61 = vsel %vm813_vm3, 1.0, %v2244_v57 }
 0x972   :  { %v819_v24 = vmul.f32 0.3275911, %v817_v21  ;;  %v843_v37 = vsub.f32 0.0, %v817_v21 }
 0x974   :  { %v2150_v26 = vpop.eup %2149  ;;  %v821_v27 = vadd.f32 1.0, %v819_v24  ;;  %v845_v42 = vmul.f32 %v843_v37, %v817_v21 }
 0x975   :  { %v824_v28 = vmul.f32 1.0614054, %v2150_v26 }
 0x976   :  { %2151 = vrcp.f32 %v821_v27  ;;  %v848_v8 = vmul.f32 1.442695, %v845_v42 }
 0x977   :  { %v826_v29 = vadd.f32 -1.4531521, %v824_v28  ;;  %2153 = vpow2.f32 %v846_v36 }
 0x978   :  { %2155 = vpow2.f32 %v848_v8  ;;  %v1950_v8 = vld [vmem:[%s2779_s0 + $0x3] sm:$0x1] }
 0x979   :  { %v828_v32 = vmul.f32 %v2150_v26, %v826_v29  ;;  %v2102_v29 = vld [vmem:[%s2779_s0 + $0x2] ss:$0 sm:$0xff] }
 0x97b   :  { %v830_v33 = vadd.f32 1.4214138, %v828_v32 }
 0x97c   :  { %v2152_v35 = vpop.eup %2151 }
 0x97d   :  { %v832_v38 = vmul.f32 %v2150_v26, %v830_v33  ;;  %v825_v39 = vmul.f32 1.0614054, %v2152_v35  ;;  %v2154_v49 = vpop.eup %2153 }
 0x97e   :  { %v2156_v56 = vpop.eup %2155 }
 0x97f   :  { %v834_v40 = vadd.f32 -0.28449672, %v832_v38  ;;  %v827_v41 = vadd.f32 -1.4531521, %v825_v39 }
 0x981   :  { %v836_v43 = vmul.f32 %v2150_v26, %v834_v40  ;;  %v829_v44 = vmul.f32 %v2152_v35, %v827_v41 }
 0x983   :  { %v838_v45 = vadd.f32 0.2548296, %v836_v43  ;;  %v831_v46 = vadd.f32 1.4214138, %v829_v44  ;;  %v1949_v44 = vld [vmem:[%s2779_s0 + $0x2] sm:$0x1] }
 0x985   :  { %v840_v47 = vmul.f32 %v2150_v26, %v838_v45  ;;  %v833_v48 = vmul.f32 %v2152_v35, %v831_v46 }
 0x987   :  { %v850_v50 = vmul.f32 %v2154_v49, %v840_v47  ;;  %v835_v51 = vadd.f32 -0.28449672, %v833_v48  ;;  %v994_v48 = vadd.f32 1.0, %v1949_v44 }
 0x989   :  { %v837_v52 = vmul.f32 %v2152_v35, %v835_v51  ;;  %v852_v53 = vsub.f32 1.0, %v850_v50  ;;  %v995_v51 = vadd.f32 1.0, %v1950_v8 }
 0x98b   :  { %v839_v54 = vadd.f32 0.2548296, %v837_v52  ;;  %v854_v59 = vmul.f32 %v852_v53, %v814_v58 }
 0x98d   :  { %v841_v55 = vmul.f32 %v2152_v35, %v839_v54  ;;  %v856_v62 = vadd.f32 1.0, %v854_v59  ;;  %v998_v54 = vperm.slane %v994_v48, 0 }
 0x98f   :  { %v851_v60 = vmul.f32 %v2156_v56, %v841_v55  ;;  %v858_v6 = vmul.f32 %v856_v62, %v808_v1  ;;  %v999_v56 = vperm.slane %v995_v51, 0 }
 0x991   :  { %v853_v3 = vsub.f32 1.0, %v851_v60 }
 0x993   :  { %v855_v63 = vmul.f32 %v853_v3, %v815_v61 }
 0x995   :  { %v857_v5 = vadd.f32 1.0, %v855_v63 }
 0x997   :  { %v859_v7 = vmul.f32 %v857_v5, %v809_v4  ;;  %v2103_v5 = vld [vmem:[%s2785_s6 + $0x3] ss:$0 sm:$0xff] }
 0x999   :  { %v860_v9 = vpack.c.bf16 %v859_v7, %v858_v6 }
 0x99b   :  { %939 = vmatmul.bf16.vlgmr.msra.gmra.mxu1 %v860_v9 }
 0xa18   :  { %v940_v13 = vpop.f32.mrf.mxu1 }
 0xa19   :  { %v941_v14 = vadd.f32 %v940_v13, %v929_v11 }
 0xa1b   :  { %v2536_v16 = vadd.f32 %v941_v14, %v2467_v15 }
 0xa1d   :  { %v950_v17 = vsel %vm32_vm0, %v2536_v16, 0.0 }
 0xa1e   :  { %951 = vadd.xlane.f32.xlu2 %v950_v17 }
 0xa20   :  { %v942_v18 = vpop.f32.mrf.mxu1 }
 0xa21   :  { %v943_v19 = vadd.f32 %v942_v18, %v929_v11 }
 0xa23   :  { %v2541_v10 = vadd.f32 %v943_v19, %v2472_v22 }
 0xa25   :  { %v953_v20 = vsel %vm32_vm0, %v2541_v10, 0.0 }
 0xa26   :  { %954 = vadd.xlane.f32.xlu0 %v953_v20 }
 0xa3a   :  { %1010 = vrot.lane.b32.xlu0 %v2101_v23, %s2232_s30 }
 0xa91   :  { %v952_v15 = vpop.xlane.xlu2 %951 }
 0xa92   :  { %v956_v0 = vmul.f32 %v952_v15, %v2310_v12 }
 0xa94   :  { %v958_v21 = vsub.f32 %v2536_v16, %v956_v0 }
 0xa96   :  { %v960_v24 = vmul.f32 %v958_v21, %v958_v21 }
 0xa98   :  { %v962_v25 = vsel %vm32_vm0, %v960_v24, 0.0 }
 0xa99   :  { %v955_v22 = vpop.xlane.xlu0 %954  ;;  %963 = vadd.xlane.f32.xlu1 %v962_v25 }
 0xa9a   :  { %v957_v26 = vmul.f32 %v955_v22, %v2310_v12 }
 0xa9c   :  { %v959_v2 = vsub.f32 %v2541_v10, %v957_v26 }
 0xa9e   :  { %v961_v27 = vmul.f32 %v959_v2, %v959_v2 }
 0xaa0   :  { %v965_v28 = vsel %vm32_vm0, %v961_v27, 0.0 }
 0xaa1   :  { %966 = vadd.xlane.f32.xlu2 %v965_v28 }
 0xaac   :  { %v1011_v61 = vpop.permute.xlu0 %1010 }
 0xab9   :  { %1008 = vrot.lane.b32.xlu2 %v2102_v29, %s2232_s30 }
 0xb0c   :  { %v964_v31 = vpop.xlane.xlu1 %963 }
 0xb0d   :  { %v968_v32 = vmul.f32 %v964_v31, %v2310_v12 }
 0xb0f   :  { %v970_v33 = vadd.f32 1e-05, %v968_v32 }
 0xb11   :  { %2157 = vrsqrt.f32 %v970_v33  ;;  %vm978_vm5 = vweird.f32 %v970_v33 }
 0xb14   :  { %v967_v35 = vpop.xlane.xlu2 %966 }
 0xb15   :  { %v969_v36 = vmul.f32 %v967_v35, %v2310_v12 }
 0xb17   :  { %v2158_v37 = vpop.eup %2157  ;;  %v971_v38 = vadd.f32 1e-05, %v969_v36 }
 0xb18   :  { %v973_v39 = vmul.f32 %v2158_v37, %v970_v33  ;;  %vm979_vm4 = vweird.f32 %v2158_v37 }
 0xb19   :  { %2159 = vrsqrt.f32 %v971_v38  ;;  %vm980_vm6 = vmor %vm978_vm5, %vm979_vm4  ;;  %vm988_vm10 = vweird.f32 %v971_v38 }
 0xb1a   :  { %v974_v40 = vmul.f32 %v2158_v37, %v973_v39 }
 0xb1c   :  { %v975_v41 = vmul.f32 0.5, %v974_v40  ;;  %v1009_v3 = vpop.permute.xlu2 %1008 }
 0xb1e   :  { %v976_v42 = vsub.f32 1.5, %v975_v41 }
 0xb1f   :  { %v2160_v43 = vpop.eup %2159 }
 0xb20   :  { %v983_v45 = vmul.f32 %v2160_v43, %v971_v38  ;;  %v977_v46 = vmul.f32 %v2158_v37, %v976_v42  ;;  %vm989_vm7 = vweird.f32 %v2160_v43 }
 0xb21   :  { %vm990_vm11 = vmor %vm988_vm10, %vm989_vm7 }
 0xb22   :  { %v984_v47 = vmul.f32 %v2160_v43, %v983_v45  ;;  %v981_v50 = vsel %vm980_vm6, %v2158_v37, %v977_v46 }
 0xb23   :  { %v992_v53 = vmul.f32 %v981_v50, %v958_v21 }
 0xb24   :  { %v985_v49 = vmul.f32 0.5, %v984_v47 }
 0xb25   :  { %v1002_v59 = vmul.f32 %v998_v54, %v992_v53 }
 0xb26   :  { %v986_v52 = vsub.f32 1.5, %v985_v49 }
 0xb27   :  { %v1014_v63 = vadd.f32 %v1009_v3, %v1002_v59 }
 0xb28   :  { %v987_v55 = vmul.f32 %v2160_v43, %v986_v52 }
 0xb2a   :  { %v991_v58 = vsel %vm990_vm11, %v2160_v43, %v987_v55 }
 0xb2b   :  { %v993_v60 = vmul.f32 %v991_v58, %v959_v2 }
 0xb2d   :  { %v1003_v62 = vmul.f32 %v999_v56, %v993_v60 }
 0xb2f   :  { %v1015_v1 = vadd.f32 %v1011_v61, %v1003_v62 }
 0xb31   :  { %v1016_v4 = vpack.c.bf16 %v1015_v1, %v1014_v63 }
 0xb33   :  { %1964 = vmatmul.msk.bf16.vlgmr.msra.gmra.mxu2 %vm32_vm0, %v1016_v4 }
 0xbb6   :  { %v1051_v6 = vpop.f32.mrf.mxu2 }
 0xbb7   :  { %v1052_v7 = vadd.f32 %v2103_v5, %v1051_v6 }
 0xbb9   :  { %v1056_v9 = vpack.c.bf16 %v1052_v7, %v1052_v7  ;;  %v1974_v7 = vld [vmem:[%s2782_s3 + $0x14] sm:$0xf] }
 0xbbb   :  { %v1059_v11 = vunpack.c.l.b16 %v1056_v9 }
 0xbbd   :  { %v2577_v13 = vpack.c.b16 %v1059_v11, %v1059_v11 }
 0xbbe   :  { %v1053_v14 = vpop.f32.mrf.mxu2 }
 0xbbf   :  { %v1054_v17 = vadd.f32 %v2103_v5, %v1053_v14  ;;  %1179 = vrot.lane.b32.xlu2 %v2577_v13, %s2234_s20  ;;  %1061 = vrot.lane.b32.xlu1 %v2577_v13, %s2232_s30 }
 0xbc1   :  { %v1057_v18 = vpack.c.bf16 %v1054_v17, %v1054_v17 }
 0xbc3   :  { %v1083_v19 = vunpack.c.l.b16 %v1057_v18 }
 0xbc5   :  { %v2583_v20 = vpack.c.b16 %v1083_v19, %v1083_v19 }
 0xbc7   :  { %1085 = vrot.lane.b32.xlu0 %v2583_v20, %s2232_s30  ;;  %1200 = vrot.lane.b32.xlu2 %v2583_v20, %s2233_s19 }
 0xbc8   :  { %1177 = vrot.lane.b32.xlu1 %v2577_v13, %s2233_s19 }
 0xbcf   :  { %1202 = vrot.lane.b32.xlu0 %v2583_v20, %s2234_s20 }
 0xc19   :  { %v1180_v0 = vpop.permute.xlu2 %1179 }
 0xc1a   :  { %v1185_v25 = vsel %vm151_vm8, %v1180_v0, 0 }
 0xc21   :  { %v1201_v2 = vpop.permute.xlu2 %1200 }
 0xc31   :  { %v1062_v23 = vpop.permute.xlu1 %1061 }
 0xc32   :  { %v1067_v15 = vsel %vm151_vm8, %v1062_v23, 0 }
 0xc33   :  { %1076 = vmatpush.bf16.xpose.msra.mxu3 %v1067_v15 }
 0xc39   :  { %v1086_v21 = vpop.permute.xlu0 %1085 }
 0xc3a   :  { %v1091_v24 = vsel %vm151_vm8, %v1086_v21, 0  ;;  %1965 = vmatmul.msk.bf16.vlgmr.msra.gmra.mxu3 %vm151_vm8, %v1056_v9  ;;  %v1178_v27 = vpop.permute.xlu1 %1177  ;;  %v1297_v9 = vsel %vm226_vm9, %v1974_v7, 0 }
 0xc3b   :  { %1100 = vmatpush.bf16.xpose.msra.mxu0 %v1091_v24 }
 0xc41   :  { %v1203_v22 = vpop.permute.xlu0 %1202 }
 0xc42   :  { %v1208_v26 = vsel %vm151_vm8, %v1203_v22, 0  ;;  %1966 = vmatmul.msk.bf16.vlgmr.msra.gmra.mxu0 %vm151_vm8, %v1057_v18 }
 0xc43   :  { %1194 = vmatpush.bf16.xpose.msrb.mxu0 %v1185_v25  ;;  %1217 = vmatpush.bf16.xpose.msrb.mxu1 %v1208_v26 }
 0xc4a   :  { %1971 = vmatmul.msk.bf16.vlgmr.msrb.gmra.mxu1 %vm151_vm8, %v1201_v2 }
 0xc4b   :  { %1306 = vmatpush.bf16.msra.mxu0 %v1297_v9 }
 0xc52   :  { %1970 = vmatmul.msk.bf16.vlgmr.msrb.gmra.mxu0 %vm151_vm8, %v1178_v27 }
 0xcbd   :  { %v1078_v28 = vpop.f32.mrf.mxu3 }
 0xcbe   :  { %v1106_v29 = vmul.f32 0.35355338, %v1078_v28 }
 0xcbf   :  { %v1102_v30 = vpop.f32.mrf.mxu0 }
 0xcc0   :  { %v1108_v31 = vsel %vm151_vm8, %v1106_v29, -inf  ;;  %v1107_v51 = vmul.f32 0.35355338, %v1102_v30 }
 0xcc1   :  { %1109 = vmax.xlane.f32.xlu1 %v1108_v31 }
 0xcc2   :  { %v1111_v52 = vsel %vm151_vm8, %v1107_v51, -inf }
 0xcc5   :  { %v1080_v32 = vpop.f32.mrf.mxu3 }
 0xcc7   :  { %v1104_v33 = vpop.f32.mrf.mxu0  ;;  %v1219_v34 = vpop.f32.mrf.mxu1 }
 0xcc8   :  { %v1224_v53 = vmul.f32 0.35355338, %v1219_v34 }
 0xcca   :  { %v1228_v54 = vsel %vm151_vm8, %v1224_v53, -inf }
 0xccf   :  { %v1196_v35 = vpop.f32.mrf.mxu0  ;;  %v1221_v36 = vpop.f32.mrf.mxu1 }
 0xcd0   :  { %v1223_v37 = vmul.f32 0.35355338, %v1196_v35 }
 0xcd2   :  { %v1225_v38 = vsel %vm151_vm8, %v1223_v37, -inf }
 0xcd3   :  { %1226 = vmax.xlane.f32.xlu0 %v1225_v38 }
 0xcd7   :  { %v1198_v39 = vpop.f32.mrf.mxu0 }
 0xcda   :  { %1132 = vrot.lane.b32.xlu1 %v2577_v13, %s2241_s27 }
 0xce2   :  { %1333 = vrot.lane.b32.xlu1 %v2577_v13, %s2239_s25 }
 0xd34   :  { %v1110_v40 = vpop.xlane.xlu1 %1109 }
 0xd35   :  { %v1114_v41 = vsub.f32 %v1106_v29, %v1110_v40 }
 0xd37   :  { %v1116_v42 = vmul.f32 1.442695, %v1114_v41 }
 0xd39   :  { %2161 = vpow2.f32 %v1116_v42 }
 0xd3f   :  { %v2162_v43 = vpop.eup %2161 }
 0xd40   :  { %v1120_v44 = vsel %vm151_vm8, %v2162_v43, 0.0 }
 0xd41   :  { %1121 = vadd.xlane.f32.xlu2 %v1120_v44 }
 0xd46   :  { %v1227_v45 = vpop.xlane.xlu0 %1226 }
 0xd47   :  { %v1231_v46 = vsub.f32 %v1223_v37, %v1227_v45 }
 0xd49   :  { %v1233_v8 = vmul.f32 1.442695, %v1231_v46 }
 0xd4b   :  { %2163 = vpow2.f32 %v1233_v8 }
 0xd4c   :  { %v1133_v47 = vpop.permute.xlu1 %1132 }
 0xd4d   :  { %v1138_v48 = vsel %vm226_vm9, %v1133_v47, 0 }
 0xd4e   :  { %1147 = vmatpush.bf16.msrb.mxu2 %v1138_v48 }
 0xd51   :  { %v2164_v49 = vpop.eup %2163 }
 0xd52   :  { %v1237_v50 = vsel %vm151_vm8, %v2164_v49, 0.0 }
 0xd53   :  { %1238 = vadd.xlane.f32.xlu0 %v1237_v50 }
 0xd54   :  { %v1334_v6 = vpop.permute.xlu1 %1333 }
 0xd59   :  { %1249 = vrot.lane.b32.xlu2 %v2577_v13, %s2235_s21 }
 0xd67   :  { %1335 = vrot.lane.b32.xlu0 %v2577_v13, %s2236_s22 }
 0xd82   :  { %1112 = vmax.xlane.f32.xlu2 %v1111_v52 }
 0xd91   :  { %1229 = vmax.xlane.f32.xlu0 %v1228_v54  ;;  %v1969_v54 = vld [vmem:[%s2782_s3 + $0x10] sm:$0xf] }
 0xd9a   :  { %1153 = vrot.lane.b32.xlu2 %v2583_v20, %s2241_s27 }
 0xda2   :  { %1356 = vrot.lane.b32.xlu2 %v2583_v20, %s2239_s25 }
 0xdaa   :  { %1405 = vrot.lane.b32.xlu2 %v2577_v13, %s2237_s23 }
 0xdb2   :  { %1473 = vrot.lane.b32.xlu2 %v2577_v13, %s2238_s24 }
 0xdb4   :  { %v1122_v55 = vpop.xlane.xlu2 %1121 }
 0xdb5   :  { %2165 = vrcp.f32 %v1122_v55  ;;  %v1317_v55 = vsel %vm226_vm9, %v1969_v54, 0 }
 0xdb6   :  { %1326 = vmatpush.bf16.msra.mxu1 %v1317_v55 }
 0xdba   :  { %1496 = vrot.lane.b32.xlu2 %v2583_v20, %s2238_s24 }
 0xdbb   :  { %v2166_v56 = vpop.eup %2165 }
 0xdbc   :  { %v1128_v58 = vmul.f32 %v2166_v56, %v2162_v43  ;;  %v1250_v59 = vpop.permute.xlu2 %1249 }
 0xdbd   :  { %v1255_v60 = vsel %vm226_vm9, %v1250_v59, 0 }
 0xdbe   :  { %v1130_v3 = vpack.c.bf16 %v1128_v58, %v1128_v58  ;;  %1264 = vmatpush.bf16.msra.mxu2 %v1255_v60 }
 0xdc0   :  { %1967 = vmatmul.msk.bf16.vlgmr.msrb.gmra.mxu2 %vm151_vm8, %v1130_v3 }
 0xdc2   :  { %1471 = vrot.lane.b32.xlu2 %v2577_v13, %s2240_s26 }
 0xdc6   :  { %v1239_v61 = vpop.xlane.xlu0 %1238 }
 0xdc7   :  { %2167 = vrcp.f32 %v1239_v61 }
 0xdca   :  { %1494 = vrot.lane.b32.xlu2 %v2583_v20, %s2240_s26 }
 0xdcd   :  { %v2168_v62 = vpop.eup %2167 }
 0xdce   :  { %v1245_v63 = vmul.f32 %v2168_v62, %v2164_v49 }
 0xdd0   :  { %v1247_v1 = vpack.c.bf16 %v1245_v63, %v1245_v63 }
 0xdd2   :  { %1972 = vmatmul.msk.bf16.vlgmr.msra.gmra.mxu2 %vm151_vm8, %v1247_v1 }
 0xdd9   :  { %v1336_v4 = vpop.permute.xlu0 %1335 }
 0xdda   :  { %v1341_v5 = vsel %vm151_vm8, %v1336_v4, 0 }
 0xddb   :  { %1350 = vmatpush.bf16.xpose.msrb.mxu2 %v1341_v5 }
 0xde2   :  { %1977 = vmatmul.msk.bf16.vlgmr.msrb.gmra.mxu2 %vm151_vm8, %v1334_v6 }
 0xdf5   :  { %v1113_v11 = vpop.xlane.xlu2 %1112 }
 0xdf6   :  { %v1115_v14 = vsub.f32 %v1107_v51, %v1113_v11 }
 0xdf8   :  { %v1118_v17 = vmul.f32 1.442695, %v1115_v14 }
 0xdfa   :  { %2169 = vpow2.f32 %v1118_v17 }
 0xdfd   :  { %v1154_v18 = vpop.permute.xlu2 %1153 }
 0xdfe   :  { %v1159_v19 = vsel %vm226_vm9, %v1154_v18, 0 }
 0xdff   :  { %1168 = vmatpush.bf16.msrb.mxu3 %v1159_v19 }
 0xe00   :  { %v2170_v23 = vpop.eup %2169 }
 0xe01   :  { %v1123_v15 = vsel %vm151_vm8, %v2170_v23, 0.0 }
 0xe02   :  { %1124 = vadd.xlane.f32.xlu1 %v1123_v15 }
 0xe04   :  { %v1230_v0 = vpop.xlane.xlu0 %1229 }
 0xe05   :  { %v1232_v21 = vsub.f32 %v1224_v53, %v1230_v0  ;;  %v1357_v24 = vpop.permute.xlu2 %1356 }
 0xe07   :  { %v1235_v25 = vmul.f32 1.442695, %v1232_v21 }
 0xe09   :  { %2171 = vpow2.f32 %v1235_v25 }
 0xe0d   :  { %v1406_v22 = vpop.permute.xlu2 %1405 }
 0xe0e   :  { %v1411_v26 = vsel %vm226_vm9, %v1406_v22, 0 }
 0xe0f   :  { %v2172_v2 = vpop.eup %2171  ;;  %1420 = vmatpush.bf16.msrb.mxu0 %v1411_v26 }
 0xe10   :  { %v1240_v27 = vsel %vm151_vm8, %v2172_v2, 0.0 }
 0xe11   :  { %1241 = vadd.xlane.f32.xlu0 %v1240_v27 }
 0xe15   :  { %v1474_v46 = vpop.permute.xlu2 %1473 }
 0xe16   :  { %v1479_v48 = vsel %vm151_vm8, %v1474_v46, 0 }
 0xe1b   :  { %1270 = vrot.lane.b32.xlu1 %v2583_v20, %s2235_s21 }
 0xe1d   :  { %v1497_v49 = vpop.permute.xlu2 %1496 }
 0xe1e   :  { %v1502_v63 = vsel %vm151_vm8, %v1497_v49, 0 }
 0xe25   :  { %1358 = vrot.lane.b32.xlu0 %v2583_v20, %s2236_s22  ;;  %v1472_v50 = vpop.permute.xlu2 %1471 }
 0xe2d   :  { %v1495_v0 = vpop.permute.xlu2 %1494 }
 0xe43   :  { %v1149_v28 = vpop.f32.mrf.mxu2 }
 0xe4b   :  { %v1151_v29 = vpop.f32.mrf.mxu2 }
 0xe55   :  { %v1266_v30 = vpop.f32.mrf.mxu2 }
 0xe5d   :  { %v1268_v31 = vpop.f32.mrf.mxu2 }
 0xe65   :  { %v1352_v32 = vpop.f32.mrf.mxu2 }
 0xe66   :  { %v1379_v33 = vmul.f32 0.35355338, %v1352_v32 }
 0xe68   :  { %v1381_v34 = vsel %vm151_vm8, %v1379_v33, -inf }
 0xe69   :  { %1382 = vmax.xlane.f32.xlu0 %v1381_v34 }
 0xe6d   :  { %v1354_v35 = vpop.f32.mrf.mxu2 }
 0xe75   :  { %v1125_v36 = vpop.xlane.xlu1 %1124 }
 0xe76   :  { %2173 = vrcp.f32 %v1125_v36 }
 0xe7c   :  { %v2174_v37 = vpop.eup %2173 }
 0xe7d   :  { %v1129_v38 = vmul.f32 %v2174_v37, %v2170_v23 }
 0xe7f   :  { %v1131_v39 = vpack.c.bf16 %v1129_v38, %v1129_v38 }
 0xe81   :  { %1968 = vmatmul.msk.bf16.vlgmr.msrb.gmra.mxu3 %vm151_vm8, %v1131_v39 }
 0xe84   :  { %v1242_v40 = vpop.xlane.xlu0 %1241 }
 0xe85   :  { %2175 = vrcp.f32 %v1242_v40 }
 0xe8b   :  { %v2176_v41 = vpop.eup %2175 }
 0xe8c   :  { %v1246_v42 = vmul.f32 %v2176_v41, %v2172_v2 }
 0xe8d   :  { %v1271_v43 = vpop.permute.xlu1 %1270 }
 0xe8e   :  { %v1276_v44 = vsel %vm226_vm9, %v1271_v43, 0  ;;  %v1248_v45 = vpack.c.bf16 %v1246_v42, %v1246_v42 }
 0xe8f   :  { %1285 = vmatpush.bf16.msra.mxu3 %v1276_v44 }
 0xe92   :  { %1973 = vmatmul.msk.bf16.vlgmr.msra.gmra.mxu3 %vm151_vm8, %v1248_v45 }
 0xe97   :  { %v1359_v8 = vpop.permute.xlu0 %1358 }
 0xe98   :  { %v1364_v47 = vsel %vm151_vm8, %v1359_v8, 0 }
 0xe99   :  { %1373 = vmatpush.bf16.xpose.msrb.mxu3 %v1364_v47 }
 0xea1   :  { %1488 = vmatpush.bf16.xpose.msra.mxu3 %v1479_v48 }
 0xea2   :  { %1978 = vmatmul.msk.bf16.vlgmr.msrb.gmra.mxu3 %vm151_vm8, %v1357_v24 }
 0xeb2   :  { %1983 = vmatmul.msk.bf16.vlgmr.msra.gmra.mxu3 %vm151_vm8, %v1472_v50 }
 0xedc   :  { %v1383_v51 = vpop.xlane.xlu0 %1382 }
 0xedd   :  { %v1387_v52 = vsub.f32 %v1379_v33, %v1383_v51 }
 0xedf   :  { %v1389_v53 = vmul.f32 1.442695, %v1387_v52  ;;  %v1981_v52 = vld [vmem:[%s2782_s3 + $0x18] sm:$0xf] }
 0xee1   :  { %2177 = vpow2.f32 %v1389_v53  ;;  %v1453_v53 = vsel %vm226_vm9, %v1981_v52, 0 }
 0xee2   :  { %1462 = vmatpush.bf16.msra.mxu2 %v1453_v53 }
 0xee7   :  { %v2178_v56 = vpop.eup %2177 }
 0xee8   :  { %v1393_v58 = vsel %vm151_vm8, %v2178_v56, 0.0 }
 0xee9   :  { %1394 = vadd.xlane.f32.xlu1 %v1393_v58 }
 0xf02   :  { %1426 = vrot.lane.b32.xlu1 %v2583_v20, %s2237_s23 }
 0xf04   :  { %v1170_v59 = vpop.f32.mrf.mxu3 }
 0xf05   :  { %v1174_v60 = vpack.c.bf16 %v1170_v59, %v1149_v28 }
 0xf07   :  { %1976 = vmatmul.msk.bf16.vlgmr.msra.gmra.mxu1 %vm151_vm8, %v1174_v60 }
 0xf0c   :  { %v1172_v3 = vpop.f32.mrf.mxu3 }
 0xf15   :  { %v1287_v61 = vpop.f32.mrf.mxu3 }
 0xf16   :  { %v1291_v62 = vpack.c.bf16 %v1287_v61, %v1266_v30 }
 0xf18   :  { %1975 = vmatmul.msk.bf16.vlgmr.msra.gmra.mxu0 %vm151_vm8, %v1291_v62 }
 0xf19   :  { %1511 = vmatpush.bf16.xpose.msra.mxu0 %v1502_v63 }
 0xf1d   :  { %v1289_v1 = vpop.f32.mrf.mxu3 }
 0xf25   :  { %v1375_v4 = vpop.f32.mrf.mxu3 }
 0xf26   :  { %v1380_v5 = vmul.f32 0.35355338, %v1375_v4 }
 0xf28   :  { %v1384_v6 = vsel %vm151_vm8, %v1380_v5, -inf }
 0xf29   :  { %1385 = vmax.xlane.f32.xlu2 %v1384_v6 }
 0xf2d   :  { %v1377_v7 = vpop.f32.mrf.mxu3 }
 0xf35   :  { %v1490_v9 = vpop.f32.mrf.mxu3 }
 0xf36   :  { %v1517_v36 = vmul.f32 0.35355338, %v1490_v9  ;;  %v1987_v9 = vld [vmem:[%s2782_s3 + $0x1c] sm:$0xf]  ;;  %s1867_s3 = sshll.u32 %s2786_s7, 4  ;;  %s1868_s3 = int_to_ptr.hbm [resolvable:$true] %s1867_s3 }
 0xf38   :  { %v1519_v38 = vsel %vm151_vm8, %v1517_v36, -inf }
 0xf3d   :  { %v1492_v11 = vpop.f32.mrf.mxu3 }
 0xf3e   :  { %v1591_v11 = vsel %vm226_vm9, %v1987_v9, 0 }
 0xf3f   :  { %1600 = vmatpush.bf16.msrb.mxu3 %v1591_v11 }
 0xf41   :  { %1543 = vrot.lane.b32.xlu2 %v2577_v13, %s2242_s9 }
 0xf5c   :  { %v1395_v14 = vpop.xlane.xlu1 %1394 }
 0xf5d   :  { %2179 = vrcp.f32 %v1395_v14  ;;  %v2104_v14 = vld [vmem:[%s2785_s6 + $0x3] ss:$0 sm:$0xff] }
 0xf63   :  { %v2180_v17 = vpop.eup %2179 }
 0xf64   :  { %v1401_v18 = vmul.f32 %v2180_v17, %v2178_v56 }
 0xf66   :  { %v1403_v19 = vpack.c.bf16 %v1401_v18, %v1401_v18 }
 0xf68   :  { %1979 = vmatmul.msk.bf16.vlgmr.msrb.gmra.mxu0 %vm151_vm8, %v1403_v19 }
 0xf74   :  { %v1427_v23 = vpop.permute.xlu1 %1426 }
 0xf75   :  { %v1432_v15 = vsel %vm226_vm9, %v1427_v23, 0 }
 0xf76   :  { %1441 = vmatpush.bf16.msrb.mxu1 %v1432_v15 }
 0xf78   :  { %1984 = vmatmul.msk.bf16.vlgmr.msra.gmra.mxu0 %vm151_vm8, %v1495_v0 }
 0xf84   :  { %v1328_v21 = vpop.f32.mrf.mxu1 }
 0xf8c   :  { %v1330_v54 = vpop.f32.mrf.mxu1 }
 0xf95   :  { %v1308_v24 = vpop.f32.mrf.mxu0 }
 0xf96   :  { %v2671_v25 = vadd.f32 %v1328_v21, %v1308_v24 }
 0xf9c   :  { %v1386_v22 = vpop.xlane.xlu2 %1385 }
 0xf9d   :  { %v1388_v13 = vsub.f32 %v1380_v5, %v1386_v22  ;;  %v2675_v30 = vpop.f32.mrf.mxu0 }
 0xf9f   :  { %v1391_v26 = vmul.f32 1.442695, %v1388_v13  ;;  %v1331_v13 = vadd.f32 %v1330_v54, %v2675_v30 }
 0xfa1   :  { %2181 = vpow2.f32 %v1391_v26 }
 0xfa4   :  { %v1544_v2 = vpop.permute.xlu2 %1543 }
 0xfa5   :  { %v1549_v27 = vsel %vm226_vm9, %v1544_v2, 0 }
 0xfa6   :  { %1558 = vmatpush.bf16.msra.mxu1 %v1549_v27 }
 0xfa7   :  { %v2182_v28 = vpop.eup %2181 }
 0xfa8   :  { %v1396_v29 = vsel %vm151_vm8, %v2182_v28, 0.0 }
 0xfa9   :  { %1397 = vadd.xlane.f32.xlu0 %v1396_v29 }
 0xfe5   :  { %v1422_v31 = vpop.f32.mrf.mxu0 }
 0xfed   :  { %v1424_v32 = vpop.f32.mrf.mxu0 }
 0xff5   :  { %v1513_v33 = vpop.f32.mrf.mxu0 }
 0xff6   :  { %v1518_v34 = vmul.f32 0.35355338, %v1513_v33 }
 0xff8   :  { %v1522_v35 = vsel %vm151_vm8, %v1518_v34, -inf }
 0xff9   :  { %1523 = vmax.xlane.f32.xlu0 %v1522_v35 }
 0xffd   :  { %v1515_v37 = vpop.f32.mrf.mxu0 }
0x1001   :  { %1520 = vmax.xlane.f32.xlu0 %v1519_v38 }
0x101c   :  { %v1398_v39 = vpop.xlane.xlu0 %1397 }
0x101d   :  { %2183 = vrcp.f32 %v1398_v39 }
0x1023   :  { %v2184_v40 = vpop.eup %2183 }
0x1024   :  { %v1402_v41 = vmul.f32 %v2184_v40, %v2182_v28 }
0x1026   :  { %v1404_v42 = vpack.c.bf16 %v1402_v41, %v1402_v41  ;;  %v2105_v41 = vld [vmem:[%s2785_s6 + $0x4] ss:$0 sm:$0xff] }
0x1028   :  { %1980 = vmatmul.msk.bf16.vlgmr.msrb.gmra.mxu1 %vm151_vm8, %v1404_v42  ;;  %v2069_v42 = vld [vmem:[%s2783_s4 + $0x18] sm:$0xff] }
0x1029   :  { %1711 = vmatpush.bf16.msrb.mxu0 %v2069_v42 }
0x106c   :  { %v1524_v43 = vpop.xlane.xlu0 %1523 }
0x106d   :  { %v1526_v44 = vsub.f32 %v1518_v34, %v1524_v43 }
0x106f   :  { %v1529_v45 = vmul.f32 1.442695, %v1526_v44 }
0x1071   :  { %2185 = vpow2.f32 %v1529_v45 }
0x1074   :  { %v1521_v46 = vpop.xlane.xlu0 %1520 }
0x1075   :  { %v1525_v8 = vsub.f32 %v1517_v36, %v1521_v46  ;;  %v2068_v46 = vld [vmem:[%s2783_s4 + $0x10] sm:$0xff] }
0x1076   :  { %1712 = vmatpush.bf16.msrb.mxu0 %v2068_v46 }
0x1077   :  { %v2186_v47 = vpop.eup %2185  ;;  %v1527_v48 = vmul.f32 1.442695, %v1525_v8  ;;  %v1995_v8 = vld [vmem:[%s2785_s6 + $0x4] sm:$0x3] }
0x1078   :  { %v1534_v49 = vsel %vm151_vm8, %v2186_v47, 0.0 }
0x1079   :  { %2187 = vpow2.f32 %v1527_v48  ;;  %1535 = vadd.xlane.f32.xlu0 %v1534_v49  ;;  %v1682_v48 = vperm.slane %v1995_v8, 0  ;;  %v1683_v49 = vperm.slane %v1995_v8, 1 }
0x107f   :  { %v2188_v50 = vpop.eup %2187 }
0x1080   :  { %v1531_v51 = vsel %vm151_vm8, %v2188_v50, 0.0 }
0x1081   :  { %1532 = vadd.xlane.f32.xlu1 %v1531_v51 }
0x108d   :  { %1564 = vrot.lane.b32.xlu0 %v2583_v20, %s2242_s9 }
0x1095   :  { %1614 = vrot.lane.b32.xlu0 %v2104_v14, %s2243_s16  ;;  %s2246_s16 = smov 128  }
0x10a5   :  { %v1443_v55 = vpop.f32.mrf.mxu1 }
0x10a6   :  { %v1447_v56 = vpack.c.bf16 %v1443_v55, %v1422_v31 }
0x10a8   :  { %1982 = vmatmul.msk.bf16.vlgmr.msra.gmra.mxu2 %vm151_vm8, %v1447_v56 }
0x10ad   :  { %v1445_v58 = vpop.f32.mrf.mxu1 }
0x10ec   :  { %v1536_v59 = vpop.xlane.xlu0 %1535 }
0x10ed   :  { %2189 = vrcp.f32 %v1536_v59 }
0x10f3   :  { %v2190_v3 = vpop.eup %2189 }
0x10f4   :  { %v1533_v60 = vpop.xlane.xlu1 %1532  ;;  %v1540_v63 = vmul.f32 %v2190_v3, %v2186_v47 }
0x10f5   :  { %2191 = vrcp.f32 %v1533_v60 }
0x10f6   :  { %v1542_v20 = vpack.c.bf16 %v1540_v63, %v1540_v63 }
0x10fb   :  { %v2192_v61 = vpop.eup %2191 }
0x10fc   :  { %v1539_v62 = vmul.f32 %v2192_v61, %v2188_v50 }
0x10fe   :  { %v1541_v1 = vpack.c.bf16 %v1539_v62, %v1539_v62 }
0x10ff   :  { %v1565_v4 = vpop.permute.xlu0 %1564 }
0x1100   :  { %v1570_v5 = vsel %vm226_vm9, %v1565_v4, 0  ;;  %1985 = vmatmul.msk.bf16.vlgmr.msra.gmra.mxu1 %vm151_vm8, %v1541_v1 }
0x1101   :  { %1579 = vmatpush.bf16.msrb.mxu2 %v1570_v5 }
0x1104   :  { %1986 = vmatmul.msk.bf16.vlgmr.msrb.gmra.mxu2 %vm151_vm8, %v1542_v20 }
0x112b   :  { %v1464_v6 = vpop.f32.mrf.mxu2 }
0x112c   :  { %v1469_v7 = vadd.f32 %v1464_v6, %v2671_v25  ;;  %v1615_v25 = vpop.permute.xlu0 %1614 }
0x1133   :  { %v1466_v18 = vpop.f32.mrf.mxu2 }
0x1134   :  { %v1470_v2 = vadd.f32 %v1466_v18, %v1331_v13 }
0x117d   :  { %v1560_v17 = vpop.f32.mrf.mxu1 }
0x1185   :  { %v1562_v19 = vpop.f32.mrf.mxu1 }
0x1187   :  { %v1581_v23 = vpop.f32.mrf.mxu2 }
0x1188   :  { %v1585_v15 = vpack.c.bf16 %v1581_v23, %v1560_v17  ;;  %v2077_v17 = vld [vmem:[%s2784_s5 + $0x78] sm:$0xff]  ;;  %v2076_v23 = vld [vmem:[%s2784_s5 + $0x70] sm:$0xff] }
0x1189   :  { %1843 = vmatpush.bf16.msrb.mxu1 %v2077_v17 }
0x118a   :  { %1988 = vmatmul.msk.bf16.vlgmr.msrb.gmra.mxu3 %vm151_vm8, %v1585_v15 }
0x118d   :  { %1844 = vmatpush.bf16.msrb.mxu1 %v2076_v23 }
0x118f   :  { %v1583_v0 = vpop.f32.mrf.mxu2 }
0x120d   :  { %v1602_v21 = vpop.f32.mrf.mxu3 }
0x120e   :  { %v1607_v24 = vadd.f32 %v1602_v21, %v1469_v7  ;;  %v2075_v21 = vld [vmem:[%s2784_s5 + $0x68] sm:$0xff] }
0x120f   :  { %1845 = vmatpush.bf16.msrb.mxu1 %v2075_v21 }
0x1210   :  { %v1609_v22 = vadd.f32 %v1607_v24, %v2536_v16 }
0x1212   :  { %v2704_v26 = vadd.f32 %v1615_v25, %v1609_v22  ;;  %v2074_v22 = vld [vmem:[%s2784_s5 + $0x60] sm:$0xff] }
0x1213   :  { %1846 = vmatpush.bf16.msrb.mxu1 %v2074_v22 }
0x1214   :  { %v1620_v27 = vsel %vm32_vm0, %v2704_v26, 0.0 }
0x1215   :  { %1621 = vadd.xlane.f32.xlu0 %v1620_v27  ;;  %v1604_v28 = vpop.f32.mrf.mxu3 }
0x1216   :  { %v1608_v29 = vadd.f32 %v1604_v28, %v1470_v2  ;;  %v2073_v28 = vld [vmem:[%s2784_s5 + $0x58] sm:$0xff] }
0x1217   :  { %1847 = vmatpush.bf16.msrb.mxu1 %v2073_v28 }
0x1218   :  { %v1610_v31 = vadd.f32 %v1608_v29, %v2541_v10 }
0x121a   :  { %v2709_v32 = vadd.f32 %v1615_v25, %v1610_v31 }
0x121c   :  { %v1623_v33 = vsel %vm32_vm0, %v2709_v32, 0.0 }
0x121d   :  { %1624 = vadd.xlane.f32.xlu2 %v1623_v33 }
0x1229   :  { %1696 = vrot.lane.b32.xlu0 %v1682_v48, %s2241_s27 }
0x1235   :  { %1698 = vrot.lane.b32.xlu2 %v1683_v49, %s2241_s27 }
0x1288   :  { %v1622_v16 = vpop.xlane.xlu0 %1621 }
0x1289   :  { %v1626_v30 = vmul.f32 %v1622_v16, %v2310_v12  ;;  %v2072_v16 = vld [vmem:[%s2784_s5 + $0x50] sm:$0xff] }
0x128a   :  { %1848 = vmatpush.bf16.msrb.mxu1 %v2072_v16 }
0x128b   :  { %v1628_v34 = vsub.f32 %v2704_v26, %v1626_v30 }
0x128d   :  { %v1630_v35 = vmul.f32 %v1628_v34, %v1628_v34 }
0x128f   :  { %v1632_v36 = vsel %vm32_vm0, %v1630_v35, 0.0  ;;  %v2071_v35 = vld [vmem:[%s2784_s5 + $0x48] sm:$0xff] }
0x1290   :  { %1633 = vadd.xlane.f32.xlu1 %v1632_v36  ;;  %v1625_v37 = vpop.xlane.xlu2 %1624  ;;  %1849 = vmatpush.bf16.msrb.mxu1 %v2071_v35 }
0x1291   :  { %v1627_v38 = vmul.f32 %v1625_v37, %v2310_v12 }
0x1293   :  { %v1629_v10 = vsub.f32 %v2709_v32, %v1627_v38 }
0x1295   :  { %v1631_v39 = vmul.f32 %v1629_v10, %v1629_v10 }
0x1297   :  { %v1635_v40 = vsel %vm32_vm0, %v1631_v39, 0.0 }
0x1298   :  { %1636 = vadd.xlane.f32.xlu1 %v1635_v40  ;;  %v1699_v19 = vpop.permute.xlu2 %1698  ;;  %v2070_v40 = vld [vmem:[%s2784_s5 + $0x40] sm:$0xff]  ;;  %s2245_s5 = smov [#allocation2]  }
0x1299   :  { %1850 = vmatpush.bf16.msrb.mxu1 %v2070_v40 }
0x129b   :  { %v1697_v18 = vpop.permute.xlu0 %1696 }
0x129c   :  { %v1700_v15 = vsel %vm788_vm1, %v1697_v18, %v1699_v19 }
0x12b1   :  { %1669 = vrot.lane.b32.xlu1 %v2105_v41, %s2232_s30 }
0x1303   :  { %v1634_v43 = vpop.xlane.xlu1 %1633 }
0x1304   :  { %v1638_v44 = vmul.f32 %v1634_v43, %v2310_v12 }
0x1306   :  { %v1640_v45 = vadd.f32 1e-05, %v1638_v44  ;;  %v2106_v44 = vld [vmem:[%s2785_s6 + $0x5] ss:$0 sm:$0xff]  ;;  %s1865_s6 = sshll.u32 %s2245_s5, 4  ;;  %s1866_s6 = int_to_ptr.vmem [resolvable:$true] %s1865_s6 }
0x1307   :  { %1840 = vrot.lane.b32.xlu1 %v2106_v44, %s2241_s27 }
0x1308   :  { %2193 = vrsqrt.f32 %v1640_v45  ;;  %vm1648_vm9 = vweird.f32 %v1640_v45 }
0x130b   :  { %v1637_v47 = vpop.xlane.xlu1 %1636 }
0x130c   :  { %v1639_v50 = vmul.f32 %v1637_v47, %v2310_v12 }
0x130e   :  { %v2194_v51 = vpop.eup %2193  ;;  %v1641_v52 = vadd.f32 1e-05, %v1639_v50 }
0x130f   :  { %v1643_v53 = vmul.f32 %v2194_v51, %v1640_v45  ;;  %vm1649_vm8 = vweird.f32 %v2194_v51 }
0x1310   :  { %2195 = vrsqrt.f32 %v1641_v52  ;;  %vm1650_vm12 = vmor %vm1648_vm9, %vm1649_vm8  ;;  %vm1658_vm14 = vweird.f32 %v1641_v52 }
0x1311   :  { %v1644_v54 = vmul.f32 %v2194_v51, %v1643_v53 }
0x1313   :  { %v1645_v55 = vmul.f32 0.5, %v1644_v54 }
0x1315   :  { %v1646_v56 = vsub.f32 1.5, %v1645_v55 }
0x1316   :  { %v2196_v58 = vpop.eup %2195 }
0x1317   :  { %v1653_v59 = vmul.f32 %v2196_v58, %v1641_v52  ;;  %v1647_v60 = vmul.f32 %v2194_v51, %v1646_v56  ;;  %vm1659_vm13 = vweird.f32 %v2196_v58 }
0x1318   :  { %vm1660_vm15 = vmor %vm1658_vm14, %vm1659_vm13 }
0x1319   :  { %v1654_v3 = vmul.f32 %v2196_v58, %v1653_v59  ;;  %v1651_v62 = vsel %vm1650_vm12, %v2194_v51, %v1647_v60 }
0x131a   :  { %v1662_v1 = vmul.f32 %v1651_v62, %v1628_v34 }
0x131b   :  { %v1655_v61 = vmul.f32 0.5, %v1654_v3 }
0x131c   :  { %v1667_v6 = vmul.f32 %v2105_v41, %v1662_v1 }
0x131d   :  { %v1656_v12 = vsub.f32 1.5, %v1655_v61 }
0x131f   :  { %v1657_v63 = vmul.f32 %v2196_v58, %v1656_v12 }
0x1321   :  { %v1661_v4 = vsel %vm1660_vm15, %v2196_v58, %v1657_v63 }
0x1322   :  { %v1663_v5 = vmul.f32 %v1661_v4, %v1629_v10 }
0x1323   :  { %v1670_v20 = vpop.permute.xlu1 %1669 }
0x1324   :  { %v1668_v7 = vmul.f32 %v2105_v41, %v1663_v5  ;;  %v1672_v9 = vadd.f32 %v1670_v20, %v1667_v6 }
0x1326   :  { %v1673_v11 = vadd.f32 %v1670_v20, %v1668_v7 }
0x1328   :  { %v1674_v14 = vpack.c.bf16 %v1673_v11, %v1672_v9 }
0x132a   :  { %2004 = vmatmul.msk.bf16.vlgmr.msrb.gmra.mxu0 %vm32_vm0, %v1674_v14 }
0x1379   :  { %v1841_v21 = vpop.permute.xlu1 %1840 }
0x13a7   :  { %v1714_v0 = vpop.f32.mrf.mxu0 }
0x13a8   :  { %v2747_v24 = vadd.f32 %v1714_v0, %v1700_v15 }
0x13aa   :  { %v1721_v25 = vmul.f32 0.70710677, %v2747_v24  ;;  %v1719_v17 = vmul.f32 0.5, %v2747_v24 }
0x13ac   :  { %v1727_v13 = vand.u32 2147483647, %v1721_v25  ;;  %vm1723_vm1 = vcmp.ge.f32.partialorder %v1721_v25, 0.0 }
0x13ad   :  { %v1725_v5 = vsel %vm1723_vm1, 1.0, %v2244_v57 }
0x13ae   :  { %v1729_v2 = vmul.f32 0.3275911, %v1727_v13  ;;  %v1753_v37 = vsub.f32 0.0, %v1727_v13 }
0x13af   :  { %v1716_v27 = vpop.f32.mrf.mxu0 }
0x13b0   :  { %v1731_v29 = vadd.f32 1.0, %v1729_v2  ;;  %v1717_v31 = vadd.f32 %v1716_v27, %v1700_v15  ;;  %v1755_v41 = vmul.f32 %v1753_v37, %v1727_v13 }
0x13b2   :  { %2197 = vrcp.f32 %v1731_v29  ;;  %v1722_v33 = vmul.f32 0.70710677, %v1717_v31  ;;  %v1757_v46 = vmul.f32 1.442695, %v1755_v41  ;;  %v1720_v18 = vmul.f32 0.5, %v1717_v31 }
0x13b4   :  { %v1728_v30 = vand.u32 2147483647, %v1722_v33  ;;  %vm1724_vm2 = vcmp.ge.f32.partialorder %v1722_v33, 0.0 }
0x13b5   :  { %v1726_v9 = vsel %vm1724_vm2, 1.0, %v2244_v57 }
0x13b6   :  { %v1730_v34 = vmul.f32 0.3275911, %v1728_v30  ;;  %v1754_v8 = vsub.f32 0.0, %v1728_v30 }
0x13b8   :  { %v2198_v36 = vpop.eup %2197  ;;  %v1732_v38 = vadd.f32 1.0, %v1730_v34  ;;  %v1756_v51 = vmul.f32 %v1754_v8, %v1728_v30 }
0x13b9   :  { %v1735_v10 = vmul.f32 1.0614054, %v2198_v36 }
0x13ba   :  { %2199 = vrcp.f32 %v1732_v38  ;;  %v1759_v56 = vmul.f32 1.442695, %v1756_v51 }
0x13bb   :  { %v1737_v39 = vadd.f32 -1.4531521, %v1735_v10  ;;  %2201 = vpow2.f32 %v1757_v46 }
0x13bc   :  { %2203 = vpow2.f32 %v1759_v56 }
0x13bd   :  { %v1739_v42 = vmul.f32 %v2198_v36, %v1737_v39 }
0x13bf   :  { %v1741_v43 = vadd.f32 1.4214138, %v1739_v42 }
0x13c0   :  { %v2200_v45 = vpop.eup %2199 }
0x13c1   :  { %v1743_v47 = vmul.f32 %v2198_v36, %v1741_v43  ;;  %v1736_v48 = vmul.f32 1.0614054, %v2200_v45  ;;  %v2202_v60 = vpop.eup %2201 }
0x13c2   :  { %v2204_v4 = vpop.eup %2203 }
0x13c3   :  { %v1745_v49 = vadd.f32 -0.28449672, %v1743_v47  ;;  %v1738_v50 = vadd.f32 -1.4531521, %v1736_v48 }
0x13c5   :  { %v1747_v52 = vmul.f32 %v2198_v36, %v1745_v49  ;;  %v1740_v53 = vmul.f32 %v2200_v45, %v1738_v50 }
0x13c7   :  { %v1749_v54 = vadd.f32 0.2548296, %v1747_v52  ;;  %v1742_v55 = vadd.f32 1.4214138, %v1740_v53 }
0x13c9   :  { %v1751_v58 = vmul.f32 %v2198_v36, %v1749_v54  ;;  %v1744_v59 = vmul.f32 %v2200_v45, %v1742_v55 }
0x13cb   :  { %v1761_v3 = vmul.f32 %v2202_v60, %v1751_v58  ;;  %v1746_v61 = vadd.f32 -0.28449672, %v1744_v59 }
0x13cd   :  { %v1748_v12 = vmul.f32 %v2200_v45, %v1746_v61  ;;  %v1763_v62 = vsub.f32 1.0, %v1761_v3 }
0x13cf   :  { %v1750_v63 = vadd.f32 0.2548296, %v1748_v12  ;;  %v1765_v20 = vmul.f32 %v1763_v62, %v1725_v5 }
0x13d1   :  { %v1752_v1 = vmul.f32 %v2200_v45, %v1750_v63  ;;  %v1767_v11 = vadd.f32 1.0, %v1765_v20 }
0x13d3   :  { %v1762_v6 = vmul.f32 %v2204_v4, %v1752_v1  ;;  %v1769_v23 = vmul.f32 %v1767_v11, %v1719_v17 }
0x13d5   :  { %v1764_v7 = vsub.f32 1.0, %v1762_v6 }
0x13d7   :  { %v1766_v14 = vmul.f32 %v1764_v7, %v1726_v9 }
0x13d9   :  { %v1768_v19 = vadd.f32 1.0, %v1766_v14 }
0x13db   :  { %v1770_v15 = vmul.f32 %v1768_v19, %v1720_v18 }
0x13dd   :  { %v1771_v0 = vpack.c.bf16 %v1770_v15, %v1769_v23 }
0x13df   :  { %1851 = vmatmul.bf16.vlgmr.msrb.gmra.mxu1 %v1771_v0 }
0x145c   :  { %v1852_v25 = vpop.f32.mrf.mxu1 }
0x145d   :  { %v1853_v22 = vadd.f32 %v1852_v25, %v1841_v21 }
0x145f   :  { %v1857_v13 = vadd.f32 %v1853_v22, %v2704_v26 }
0x1461   :  { %1859 = vst.msk [vmem:[#allocation2] sm:$0xff] %vm32_vm0, %v1857_v13 }
0x1464   :  { %v1854_v57 = vpop.f32.mrf.mxu1 }
0x1465   :  { %v1855_v24 = vadd.f32 %v1854_v57, %v1841_v21 }
0x1467   :  { %v1858_v2 = vadd.f32 %v1855_v24, %v2709_v32 }
0x1469   :  { %1860 = vst.msk [vmem:[#allocation2 + $0x8] sm:$0xff] %vm32_vm0, %v1858_v2 }
0x146a   :  { %1873 = dma.vmem_to_hbm [thread:$0]  %s1866_s6, 256, %s1868_s3, [#allocation3], %s2246_s16, %s2246_s16, %s2247_s29  }
0x146b   :  { %2229 = dma.done.wait [#allocation3], 256  }
0x146c   :  { %2230 = vsyncadd [#allocation3], 4294967040 }
0x146d   :  { %1878 = vsyncpa [#allocation3], 1 }

</bundles_post_ra>
